<compile_context>
chip_gen: v7x
topology: tpu7x:2x2x1
jax: 0.10.0
libtpu: 0.0.40
codegen_flags: <defaults>
</compile_context>

<pallas_src>
import math
from functools import partial

import jax
import jax.numpy as jnp
from jax.experimental import pallas as pl
from jax.experimental.pallas import tpu as pltpu


MATMUL_DTYPE = jnp.bfloat16          # MXU operand / intermediate dtype (f32 accumulation)
LN_EPS = 1e-5                        # PyTorch LayerNorm default

# --------------------- generation-aware knobs & feature probes ---------------------

_VMEM_LIMIT = None
_SINGLE_BUFFER = None


def _vmem_limit():
    """Scoped-VMEM budget: ~3/4 of physical VMEM, capped at 96 MiB.
    v5e/v6e (128 MiB physical) -> 96 MiB; v7x (64 MiB) -> 48 MiB; unknown -> 48 MiB."""
    global _VMEM_LIMIT
    if _VMEM_LIMIT is None:
        try:
            cap = int(pltpu.get_tpu_info().vmem_capacity_bytes)
            _VMEM_LIMIT = int(min(cap - cap // 4, 96 * 1024 * 1024))
        except Exception:
            _VMEM_LIMIT = 48 * 1024 * 1024
    return _VMEM_LIMIT


def _tile_targets():
    """(row-wise proj/fc M tile, FFN M tile). Bigger tiles amortize the ~0.35us
    per-grid-step overhead; shrink when physical VMEM is small (v7x)."""
    big = _vmem_limit() >= 64 * 1024 * 1024
    return (1024, 512) if big else (512, 256)


def _probe_single_buffering():
    """Feature-test pipeline_mode=pl.Buffered(1) for loop-invariant operands.
    Must be run eagerly (outside any jit trace); falls back to default buffering."""
    def k(x_ref, w_ref, o_ref):
        o_ref[...] = x_ref[...] + w_ref[...]
    try:
        x = jnp.zeros((8, 128), jnp.float32)
        out = pl.pallas_call(
            k,
            grid=(1,),
            in_specs=[
                pl.BlockSpec((8, 128), lambda i: (0, 0)),
                pl.BlockSpec((8, 128), lambda i: (0, 0),
                             pipeline_mode=pl.Buffered(1)),
            ],
            out_specs=pl.BlockSpec((8, 128), lambda i: (0, 0)),
            out_shape=jax.ShapeDtypeStruct((8, 128), jnp.float32),
        )(x, x)
        jax.block_until_ready(out)
        return True
    except Exception:
        return False


def _use_single_buffering():
    global _SINGLE_BUFFER
    if _SINGLE_BUFFER is None:
        _SINGLE_BUFFER = _probe_single_buffering()
    return _SINGLE_BUFFER


def _invariant_spec(shape):
    """BlockSpec for grid-invariant operands (weights/biases/LN params):
    constant index_map, single-buffered when supported."""
    index_map = lambda *_: (0,) * len(shape)
    if _use_single_buffering():
        return pl.BlockSpec(shape, index_map, pipeline_mode=pl.Buffered(1))
    return pl.BlockSpec(shape, index_map)


def _compiler_params(semantics):
    return pltpu.CompilerParams(dimension_semantics=semantics,
                                vmem_limit_bytes=_vmem_limit())


def _m_tile(m, target):
    # Biggest tile up to `target`; small problems use one full block.
    return m if m <= target else target


# --------------------------------- Pallas kernels ----------------------------------

def proj_kernel(x_ref, w_ref, b_ref, o_ref):
    """One wide matmul: y = x @ W + b (W pre-cast to bf16, f32 accumulation)."""
    y = jnp.dot(x_ref[...].astype(MATMUL_DTYPE), w_ref[...],
                preferred_element_type=jnp.float32) + b_ref[...]
    o_ref[...] = y.astype(o_ref.dtype)


def make_attention_kernel(inv_temperature):
    """All heads of one (batch, Tq-tile) per grid step, batched over the head dim."""
    def kernel(q_ref, k_ref, v_ref, m_ref, o_ref, a_ref):
        qh = q_ref[0]                          # (H, tq, d_k)  bf16
        kh = k_ref[0]                          # (H, Tk, d_k)  bf16
        vh = v_ref[0]                          # (H, Tk, d_v)  bf16
        masked = m_ref[0] != 0                 # (tq, Tk); True = masked out (masked_fill)
        # scores for all heads: one batched MXU contraction
        s = jnp.einsum('hqd,hkd->hqk', qh, kh,
                       preferred_element_type=jnp.float32) * inv_temperature
        s = jnp.where(masked[None, :, :], -jnp.inf, s)
        s = s - jnp.max(s, axis=-1, keepdims=True)       # stable softmax (f32)
        e = jnp.exp(s)
        p = e * pl.reciprocal(jnp.sum(e, axis=-1, keepdims=True), approx=True)
        # single stacked store of the probabilities, already in (H, B, Tq, Tk) layout
        a_ref[...] = p[:, None, :, :].astype(a_ref.dtype)
        ctx = jnp.einsum('hqk,hkd->hqd', p.astype(MATMUL_DTYPE), vh,
                         preferred_element_type=jnp.float32)
        o_ref[0] = ctx.astype(o_ref.dtype)                # (H, tq, d_v), bf16
    return kernel


def fc_ln_mask_kernel(ctx_ref, res_ref, npm_ref, w_ref, b_ref, g_ref, beta_ref, o_ref):
    """fc projection + residual add + LayerNorm + non_pad_mask, fused."""
    y = jnp.dot(ctx_ref[...].astype(MATMUL_DTYPE), w_ref[...],
                preferred_element_type=jnp.float32) + b_ref[...]
    y = y + res_ref[...].astype(jnp.float32)
    mean = jnp.mean(y, axis=-1, keepdims=True)
    var = jnp.mean(jnp.square(y - mean), axis=-1, keepdims=True)
    y = (y - mean) * jax.lax.rsqrt(var + LN_EPS) * g_ref[...] + beta_ref[...]
    o_ref[...] = (y * npm_ref[...]).astype(o_ref.dtype)


def ffn_ln_mask_kernel(x_ref, npm_ref, w1_ref, b1_ref, w2_ref, b2_ref,
                       g_ref, beta_ref, o_ref):
    """Conv1d(k=1) -> relu -> Conv1d(k=1) + residual + LayerNorm + non_pad_mask, fused."""
    x = x_ref[...]
    h = jnp.dot(x.astype(MATMUL_DTYPE), w1_ref[...],
                preferred_element_type=jnp.float32) + b1_ref[...]
    h = jnp.maximum(h, 0.0)
    y = jnp.dot(h.astype(MATMUL_DTYPE), w2_ref[...],
                preferred_element_type=jnp.float32) + b2_ref[...]
    y = y + x.astype(jnp.float32)                      # residual (f32)
    mean = jnp.mean(y, axis=-1, keepdims=True)
    var = jnp.mean(jnp.square(y - mean), axis=-1, keepdims=True)
    y = (y - mean) * jax.lax.rsqrt(var + LN_EPS) * g_ref[...] + beta_ref[...]
    o_ref[...] = (y * npm_ref[...]).astype(o_ref.dtype)


# -------------------------------- Pallas wrappers -----------------------------------

def projection(x2d, w_bf16, b_f32, *, out_dtype=MATMUL_DTYPE):
    """y = x2d @ W + b, M-tiled.  W is pre-cast bf16; output stored in bf16."""
    m, d_in = x2d.shape
    n_out = w_bf16.shape[1]
    tm = _m_tile(m, _tile_targets()[0])
    grid = (pl.cdiv(m, tm),)
    return pl.pallas_call(
        proj_kernel,
        grid=grid,
        in_specs=[
            pl.BlockSpec((tm, d_in), lambda i: (i, 0)),
            _invariant_spec((d_in, n_out)),
            _invariant_spec((1, n_out)),
        ],
        out_specs=pl.BlockSpec((tm, n_out), lambda i: (i, 0)),
        out_shape=jax.ShapeDtypeStruct((m, n_out), out_dtype),
        compiler_params=_compiler_params(("parallel",)),
    )(x2d, w_bf16, b_f32.reshape(1, n_out))


def attention_core(q_hm, k_hm, v_hm, mask_i8, inv_temperature, attn_dtype,
                   *, tq_target=128):
    """Head-major attention.
       q_hm (B,H,Tq,dk), k_hm (B,H,Tk,dk), v_hm (B,H,Tk,dv), mask (B,Tq,Tk) int8
       -> ctx (B,H,Tq,dv) bf16, attn (H,B,Tq,Tk)."""
    b, n_head, t_q, d_k = q_hm.shape
    t_k = k_hm.shape[2]
    d_v = v_hm.shape[3]
    tq = _m_tile(t_q, tq_target)
    grid = (b, pl.cdiv(t_q, tq))
    ctx, attn = pl.pallas_call(
        make_attention_kernel(inv_temperature),
        grid=grid,
        in_specs=[
            pl.BlockSpec((1, n_head, tq, d_k), lambda bi, qi: (bi, 0, qi, 0)),
            pl.BlockSpec((1, n_head, t_k, d_k), lambda bi, qi: (bi, 0, 0, 0)),
            pl.BlockSpec((1, n_head, t_k, d_v), lambda bi, qi: (bi, 0, 0, 0)),
            pl.BlockSpec((1, tq, t_k), lambda bi, qi: (bi, qi, 0)),     # int8 mask
        ],
        out_specs=(
            pl.BlockSpec((1, n_head, tq, d_v), lambda bi, qi: (bi, 0, qi, 0)),
            pl.BlockSpec((n_head, 1, tq, t_k), lambda bi, qi: (0, bi, qi, 0)),
        ),
        out_shape=(
            jax.ShapeDtypeStruct((b, n_head, t_q, d_v), MATMUL_DTYPE),
            jax.ShapeDtypeStruct((n_head, b, t_q, t_k), attn_dtype),
        ),
        compiler_params=_compiler_params(("parallel", "parallel")),
    )(q_hm, k_hm, v_hm, mask_i8)
    return ctx, attn


def fc_residual_ln_mask(ctx2d, res2d, npm2d, w_bf16, b, gamma, beta):
    m, d_in = ctx2d.shape
    d = w_bf16.shape[1]
    tm = _m_tile(m, _tile_targets()[0])
    grid = (pl.cdiv(m, tm),)
    return pl.pallas_call(
        fc_ln_mask_kernel,
        grid=grid,
        in_specs=[
            pl.BlockSpec((tm, d_in), lambda i: (i, 0)),
            pl.BlockSpec((tm, d), lambda i: (i, 0)),
            pl.BlockSpec((tm, 1), lambda i: (i, 0)),
            _invariant_spec((d_in, d)),
            _invariant_spec((1, d)),
            _invariant_spec((1, d)),
            _invariant_spec((1, d)),
        ],
        out_specs=pl.BlockSpec((tm, d), lambda i: (i, 0)),
        out_shape=jax.ShapeDtypeStruct((m, d), res2d.dtype),
        compiler_params=_compiler_params(("parallel",)),
    )(ctx2d, res2d, npm2d, w_bf16, b.reshape(1, d), gamma.reshape(1, d), beta.reshape(1, d))


def ffn_residual_ln_mask(x2d, npm2d, w1_bf16, b1, w2_bf16, b2, gamma, beta):
    m, d = x2d.shape
    d_inner = w1_bf16.shape[1]
    tm = _m_tile(m, _tile_targets()[1])
    grid = (pl.cdiv(m, tm),)
    return pl.pallas_call(
        ffn_ln_mask_kernel,
        grid=grid,
        in_specs=[
            pl.BlockSpec((tm, d), lambda i: (i, 0)),
            pl.BlockSpec((tm, 1), lambda i: (i, 0)),
            _invariant_spec((d, d_inner)),
            _invariant_spec((1, d_inner)),
            _invariant_spec((d_inner, d)),
            _invariant_spec((1, d)),
            _invariant_spec((1, d)),
            _invariant_spec((1, d)),
        ],
        out_specs=pl.BlockSpec((tm, d), lambda i: (i, 0)),
        out_shape=jax.ShapeDtypeStruct((m, d), x2d.dtype),
        compiler_params=_compiler_params(("parallel",)),
    )(x2d, npm2d, w1_bf16, b1.reshape(1, d_inner), w2_bf16, b2.reshape(1, d),
      gamma.reshape(1, d), beta.reshape(1, d))


# ---------------------------------- Module glue -------------------------------------

def multi_head_attention(p, q_in, k_in, v_in, attn_mask, non_pad_mask,
                         n_head, d_k, d_v, self_attention, attn_dtype=jnp.float32):
    b, t_q, d_model = q_in.shape
    t_k = k_in.shape[1]
    n_qk = n_head * d_k
    n_v = n_head * d_v
    residual2d = q_in.reshape(b * t_q, d_model)

    if self_attention:
        # One wide (D -> 3*H*dk) matmul, split afterwards with metadata-cheap XLA slices.
        qkv = projection(residual2d, p["w_qkv"], p["b_qkv"])
        q2d = qkv[:, :n_qk]
        k2d = qkv[:, n_qk:2 * n_qk]
        v2d = qkv[:, 2 * n_qk:]
    else:
        q2d = projection(residual2d, p["w_q"], p["b_q"])
        kv = projection(k_in.reshape(b * t_k, d_model), p["w_kv"], p["b_kv"])
        k2d = kv[:, :n_qk]
        v2d = kv[:, n_qk:]

    # Head-major (B, H, T, d) layout for batched-head attention; bf16 intermediates.
    q_hm = q2d.reshape(b, t_q, n_head, d_k).transpose(0, 2, 1, 3)
    k_hm = k2d.reshape(b, t_k, n_head, d_k).transpose(0, 2, 1, 3)
    v_hm = v2d.reshape(b, t_k, n_head, d_v).transpose(0, 2, 1, 3)

    mask_i8 = (attn_mask != 0).astype(jnp.int8)          # 4x less mask DMA than f32
    ctx_hm, attn_hb = attention_core(q_hm, k_hm, v_hm, mask_i8,
                                     1.0 / math.sqrt(d_k), attn_dtype)

    # "concat heads" back to (B*Tq, H*dv) (cheap XLA transpose on a bf16 intermediate).
    ctx2d = ctx_hm.transpose(0, 2, 1, 3).reshape(b * t_q, n_v)

    # Fused: fc + residual + LayerNorm + non_pad_mask (dropout = identity in eval).
    out2d = fc_residual_ln_mask(ctx2d, residual2d, non_pad_mask.reshape(b * t_q, 1),
                                p["w_fc"], p["b_fc"], p["ln_g"], p["ln_b"])

    # (H, B, Tq, Tk) -> (H*B, Tq, Tk): identical to the PyTorch layout.
    attn = attn_hb.reshape(n_head * b, t_q, t_k)
    return out2d.reshape(b, t_q, d_model), attn


def positionwise_ffn(p, x, non_pad_mask):
    b, t, d = x.shape
    y2d = ffn_residual_ln_mask(
        x.reshape(b * t, d), non_pad_mask.reshape(b * t, 1),
        p["w1"], p["b1"], p["w2"], p["b2"], p["ln_g"], p["ln_b"])
    return y2d.reshape(b, t, d)


def decoder_layer_forward(params, decoder_input, encoder_output,
                          non_pad_mask, self_attn_mask, dec_enc_attn_mask,
                          n_head, d_k, d_v, attn_dtype=jnp.float32):
    # The `*= non_pad_mask` after each sub-layer is fused into that sub-layer's
    # LayerNorm epilogue kernel (mathematically identical to the PyTorch order).
    out, self_attn = multi_head_attention(
        params["self_attn"], decoder_input, decoder_input, decoder_input,
        self_attn_mask, non_pad_mask, n_head, d_k, d_v,
        self_attention=True, attn_dtype=attn_dtype)

    out, dec_enc_attn = multi_head_attention(
        params["encoder_attn"], out, encoder_output, encoder_output,
        dec_enc_attn_mask, non_pad_mask, n_head, d_k, d_v,
        self_attention=False, attn_dtype=attn_dtype)

    out = positionwise_ffn(params["pos_ffn"], out, non_pad_mask)
    return out, self_attn, dec_enc_attn


# --------------------------------- Param handling ------------------------------------

def init_mha_params(key, d_model, n_head, d_k, d_v):
    ks = jax.random.split(key, 4)
    f32 = jnp.float32
    return {
        "w_qs": jax.random.normal(ks[0], (d_model, n_head * d_k), f32) * math.sqrt(2.0 / (d_model + d_k)),
        "b_qs": jnp.zeros((n_head * d_k,), f32),
        "w_ks": jax.random.normal(ks[1], (d_model, n_head * d_k), f32) * math.sqrt(2.0 / (d_model + d_k)),
        "b_ks": jnp.zeros((n_head * d_k,), f32),
        "w_vs": jax.random.normal(ks[2], (d_model, n_head * d_v), f32) * math.sqrt(2.0 / (d_model + d_v)),
        "b_vs": jnp.zeros((n_head * d_v,), f32),
        "w_fc": jax.random.normal(ks[3], (n_head * d_v, d_model), f32) * math.sqrt(2.0 / (n_head * d_v + d_model)),
        "b_fc": jnp.zeros((d_model,), f32),
        "ln_g": jnp.ones((d_model,), f32),
        "ln_b": jnp.zeros((d_model,), f32),
    }


def init_ffn_params(key, d_model, d_inner):
    ks = jax.random.split(key, 2)
    f32 = jnp.float32
    return {
        "w1": jax.random.normal(ks[0], (d_model, d_inner), f32) * math.sqrt(2.0 / (d_model + d_inner)),
        "b1": jnp.zeros((d_inner,), f32),
        "w2": jax.random.normal(ks[1], (d_inner, d_model), f32) * math.sqrt(2.0 / (d_inner + d_model)),
        "b2": jnp.zeros((d_model,), f32),
        "ln_g": jnp.ones((d_model,), f32),
        "ln_b": jnp.zeros((d_model,), f32),
    }


def init_decoder_layer_params(key, d_model, d_inner, n_head, d_k, d_v):
    k1, k2, k3 = jax.random.split(key, 3)
    return {
        "self_attn": init_mha_params(k1, d_model, n_head, d_k, d_v),
        "encoder_attn": init_mha_params(k2, d_model, n_head, d_k, d_v),
        "pos_ffn": init_ffn_params(k3, d_model, d_inner),
    }


def prepare_decoder_layer_params(params):
    """Runtime param form: weights pre-cast to bf16, QKV (and KV) concatenated so the
    projection kernels do one wide MXU matmul.  Biases / LN params stay f32."""
    _use_single_buffering()   # run the Buffered(1) feature probe eagerly (outside jit)

    def prep_mha(p, self_attention):
        out = {
            "w_fc": p["w_fc"].astype(MATMUL_DTYPE),
            "b_fc": p["b_fc"],
            "ln_g": p["ln_g"],
            "ln_b": p["ln_b"],
        }
        if self_attention:
            out["w_qkv"] = jnp.concatenate([p["w_qs"], p["w_ks"], p["w_vs"]],
                                           axis=1).astype(MATMUL_DTYPE)
            out["b_qkv"] = jnp.concatenate([p["b_qs"], p["b_ks"], p["b_vs"]], axis=0)
        else:
            out["w_q"] = p["w_qs"].astype(MATMUL_DTYPE)
            out["b_q"] = p["b_qs"]
            out["w_kv"] = jnp.concatenate([p["w_ks"], p["w_vs"]],
                                          axis=1).astype(MATMUL_DTYPE)
            out["b_kv"] = jnp.concatenate([p["b_ks"], p["b_vs"]], axis=0)
        return out

    def prep_ffn(p):
        return {"w1": p["w1"].astype(MATMUL_DTYPE), "b1": p["b1"],
                "w2": p["w2"].astype(MATMUL_DTYPE), "b2": p["b2"],
                "ln_g": p["ln_g"], "ln_b": p["ln_b"]}

    return {
        "self_attn": prep_mha(params["self_attn"], True),
        "encoder_attn": prep_mha(params["encoder_attn"], False),
        "pos_ffn": prep_ffn(params["pos_ffn"]),
    }


# -------------------------------------- Main -----------------------------------------

if __name__ == "__main__":
    # small synthetic shapes
    B = 2            # batch
    T_dec = 8        # decoder sequence length
    T_enc = 8        # encoder sequence length
    d_model = 32
    d_inner = 64
    n_head = 4
    d_k = 8
    d_v = 8

    root = jax.random.PRNGKey(0)
    kp, kx, ke = jax.random.split(root, 3)
    params = init_decoder_layer_params(kp, d_model, d_inner, n_head, d_k, d_v)
    run_params = prepare_decoder_layer_params(params)

    decoder_input = jax.random.normal(kx, (B, T_dec, d_model), jnp.float32)
    encoder_output = jax.random.normal(ke, (B, T_enc, d_model), jnp.float32)

    # non_pad_mask: (B, T_dec, 1), last decoder position of batch 1 is padding
    non_pad_mask = jnp.ones((B, T_dec, 1), jnp.float32).at[1, -1, 0].set(0.0)
    # self_attn_mask: causal mask, nonzero means "masked out" (masked_fill semantics)
    causal = jnp.triu(jnp.ones((T_dec, T_dec), jnp.float32), k=1)
    self_attn_mask = jnp.broadcast_to(causal, (B, T_dec, T_dec))
    # dec_enc_attn_mask: nothing masked
    dec_enc_attn_mask = jnp.zeros((B, T_dec, T_enc), jnp.float32)

    fwd = jax.jit(partial(decoder_layer_forward, n_head=n_head, d_k=d_k, d_v=d_v))
    dec_out, self_attn, dec_enc_attn = fwd(
        run_params, decoder_input, encoder_output,
        non_pad_mask, self_attn_mask, dec_enc_attn_mask)

    jax.block_until_ready((dec_out, self_attn, dec_enc_attn))

    assert dec_out.shape == (B, T_dec, d_model)
    assert self_attn.shape == (n_head * B, T_dec, T_dec)
    assert dec_enc_attn.shape == (n_head * B, T_dec, T_enc)
    assert bool(jnp.all(jnp.isfinite(dec_out)))
    assert bool(jnp.all(jnp.isfinite(self_attn)))
    assert bool(jnp.all(jnp.isfinite(dec_enc_attn)))

    print("KERNEL_OK")
</pallas_src>

<mosaic_0001>
module attributes {stable_mosaic.version = 11 : i64} {
  func.func @k(%arg0: i32, %arg1: memref<8x128xf32, #tpu.memory_space<vmem>>, %arg2: memref<8x128xf32, #tpu.memory_space<vmem>>, %arg3: memref<8x128xf32, #tpu.memory_space<vmem>>) attributes {dimension_semantics = [#tpu.dimension_semantics<arbitrary>], iteration_bounds = array<i64: 1>, scalar_prefetch = 0 : i64, scratch_operands = 0 : i64, tpu.core_type = #tpu.core_type<tc>, window_params = [{pipeline_mode = #tpu.pipeline_mode<synchronous>, transform_indices = @transform_0, window_bounds = array<i64: 8, 128>}, {pipeline_mode = #tpu.pipeline_mode<synchronous>, transform_indices = @transform_1, window_bounds = array<i64: 8, 128>}, {pipeline_mode = #tpu.pipeline_mode<synchronous>, transform_indices = @transform_2, window_bounds = array<i64: 8, 128>}]} {
    %c0 = arith.constant 0 : index
    %c0_0 = arith.constant 0 : index
    %0 = vector.load %arg1[%c0, %c0_0] : memref<8x128xf32, #tpu.memory_space<vmem>>, vector<8x128xf32>
    %c0_1 = arith.constant 0 : index
    %c0_2 = arith.constant 0 : index
    %1 = vector.load %arg2[%c0_1, %c0_2] : memref<8x128xf32, #tpu.memory_space<vmem>>, vector<8x128xf32>
    %2 = arith.addf %0, %1 : vector<8x128xf32>
    %c0_3 = arith.constant 0 : index
    %c0_4 = arith.constant 0 : index
    %3 = vector.load %arg3[%c0_3, %c0_4] : memref<8x128xf32, #tpu.memory_space<vmem>>, vector<8x128xf32>
    tpu.vector_store %arg3[%c0_3, %c0_4], %2 {strides = array<i32>} : memref<8x128xf32, #tpu.memory_space<vmem>>, vector<8x128xf32>,
    return
  }
  func.func @transform_0(%arg0: i32) -> (i32, i32) {
    %c0_i32 = arith.constant 0 : i32
    %c0_i32_0 = arith.constant 0 : i32
    %c0_i32_1 = arith.constant 0 : i32
    return %c0_i32, %c0_i32_0 : i32, i32
  }
  func.func @transform_1(%arg0: i32) -> (i32, i32) {
    %c0_i32 = arith.constant 0 : i32
    %c0_i32_0 = arith.constant 0 : i32
    %c0_i32_1 = arith.constant 0 : i32
    return %c0_i32, %c0_i32_0 : i32, i32
  }
  func.func @transform_2(%arg0: i32) -> (i32, i32) {
    %c0_i32 = arith.constant 0 : i32
    %c0_i32_0 = arith.constant 0 : i32
    %c0_i32_1 = arith.constant 0 : i32
    return %c0_i32, %c0_i32_0 : i32, i32
  }
}

module attributes {stable_mosaic.version = 11 : i64} {
  func.func @proj_kernel(%arg0: i32, %arg1: memref<16x32xf32, #tpu.memory_space<vmem>>, %arg2: memref<32x64xbf16, #tpu.memory_space<vmem>>, %arg3: memref<1x64xf32, #tpu.memory_space<vmem>>, %arg4: memref<16x64xbf16, #tpu.memory_space<vmem>>) attributes {dimension_semantics = [#tpu.dimension_semantics<parallel>], iteration_bounds = array<i64: 1>, scalar_prefetch = 0 : i64, scratch_operands = 0 : i64, tpu.core_type = #tpu.core_type<tc>, window_params = [{transform_indices = @transform_0, window_bounds = array<i64: 16, 32>}, {pipeline_mode = #tpu.pipeline_mode<synchronous>, transform_indices = @transform_1, window_bounds = array<i64: 32, 64>}, {pipeline_mode = #tpu.pipeline_mode<synchronous>, transform_indices = @transform_2, window_bounds = array<i64: 1, 64>}, {transform_indices = @transform_3, window_bounds = array<i64: 16, 64>}]} {
    %c0 = arith.constant 0 : index
    %c0_0 = arith.constant 0 : index
    %0 = vector.load %arg1[%c0, %c0_0] : memref<16x32xf32, #tpu.memory_space<vmem>>, vector<16x32xf32>
    %1 = arith.truncf %0 : vector<16x32xf32> to vector<16x32xbf16>
    %c0_1 = arith.constant 0 : index
    %c0_2 = arith.constant 0 : index
    %2 = vector.load %arg2[%c0_1, %c0_2] : memref<32x64xbf16, #tpu.memory_space<vmem>>, vector<32x64xbf16>
    %cst = arith.constant dense<0.000000e+00> : vector<16x64xf32>
    %3 = tpu.matmul %1, %2, %cst {dimension_numbers = #tpu.dot_dimension_numbers<[1], [0], [0], [1], [0, 0, 1, 1], [], []>} : vector<16x32xbf16>, vector<32x64xbf16>, vector<16x64xf32> -> vector<16x64xf32>
    %c0_3 = arith.constant 0 : index
    %c0_4 = arith.constant 0 : index
    %4 = vector.load %arg3[%c0_3, %c0_4] : memref<1x64xf32, #tpu.memory_space<vmem>>, vector<1x64xf32>
    %5 = vector.broadcast %4 : vector<1x64xf32> to vector<16x64xf32>
    %6 = arith.addf %3, %5 : vector<16x64xf32>
    %7 = arith.truncf %6 : vector<16x64xf32> to vector<16x64xbf16>
    %c0_5 = arith.constant 0 : index
    %c0_6 = arith.constant 0 : index
    %8 = vector.load %arg4[%c0_5, %c0_6] : memref<16x64xbf16, #tpu.memory_space<vmem>>, vector<16x64xbf16>
    tpu.vector_store %arg4[%c0_5, %c0_6], %7 {strides = array<i32>} : memref<16x64xbf16, #tpu.memory_space<vmem>>, vector<16x64xbf16>,
    return
  }
  func.func @transform_0(%arg0: i32) -> (i32, i32) {
    %c0_i32 = arith.constant 0 : i32
    %c0_i32_0 = arith.constant 0 : i32
    return %arg0, %c0_i32 : i32, i32
  }
  func.func @transform_1(%arg0: i32) -> (i32, i32) {
    %c0_i32 = arith.constant 0 : i32
    %c0_i32_0 = arith.constant 0 : i32
    %c0_i32_1 = arith.constant 0 : i32
    return %c0_i32, %c0_i32_0 : i32, i32
  }
  func.func @transform_2(%arg0: i32) -> (i32, i32) {
    %c0_i32 = arith.constant 0 : i32
    %c0_i32_0 = arith.constant 0 : i32
    %c0_i32_1 = arith.constant 0 : i32
    return %c0_i32, %c0_i32_0 : i32, i32
  }
  func.func @transform_3(%arg0: i32) -> (i32, i32) {
    %c0_i32 = arith.constant 0 : i32
    %c0_i32_0 = arith.constant 0 : i32
    return %arg0, %c0_i32 : i32, i32
  }
}

module attributes {stable_mosaic.version = 11 : i64} {
  func.func @proj_kernel(%arg0: i32, %arg1: memref<16x32xf32, #tpu.memory_space<vmem>>, %arg2: memref<32x96xbf16, #tpu.memory_space<vmem>>, %arg3: memref<1x96xf32, #tpu.memory_space<vmem>>, %arg4: memref<16x96xbf16, #tpu.memory_space<vmem>>) attributes {dimension_semantics = [#tpu.dimension_semantics<parallel>], iteration_bounds = array<i64: 1>, scalar_prefetch = 0 : i64, scratch_operands = 0 : i64, tpu.core_type = #tpu.core_type<tc>, window_params = [{transform_indices = @transform_0, window_bounds = array<i64: 16, 32>}, {pipeline_mode = #tpu.pipeline_mode<synchronous>, transform_indices = @transform_1, window_bounds = array<i64: 32, 96>}, {pipeline_mode = #tpu.pipeline_mode<synchronous>, transform_indices = @transform_2, window_bounds = array<i64: 1, 96>}, {transform_indices = @transform_3, window_bounds = array<i64: 16, 96>}]} {
    %c0 = arith.constant 0 : index
    %c0_0 = arith.constant 0 : index
    %0 = vector.load %arg1[%c0, %c0_0] : memref<16x32xf32, #tpu.memory_space<vmem>>, vector<16x32xf32>
    %1 = arith.truncf %0 : vector<16x32xf32> to vector<16x32xbf16>
    %c0_1 = arith.constant 0 : index
    %c0_2 = arith.constant 0 : index
    %2 = vector.load %arg2[%c0_1, %c0_2] : memref<32x96xbf16, #tpu.memory_space<vmem>>, vector<32x96xbf16>
    %cst = arith.constant dense<0.000000e+00> : vector<16x96xf32>
    %3 = tpu.matmul %1, %2, %cst {dimension_numbers = #tpu.dot_dimension_numbers<[1], [0], [0], [1], [0, 0, 1, 1], [], []>} : vector<16x32xbf16>, vector<32x96xbf16>, vector<16x96xf32> -> vector<16x96xf32>
    %c0_3 = arith.constant 0 : index
    %c0_4 = arith.constant 0 : index
    %4 = vector.load %arg3[%c0_3, %c0_4] : memref<1x96xf32, #tpu.memory_space<vmem>>, vector<1x96xf32>
    %5 = vector.broadcast %4 : vector<1x96xf32> to vector<16x96xf32>
    %6 = arith.addf %3, %5 : vector<16x96xf32>
    %7 = arith.truncf %6 : vector<16x96xf32> to vector<16x96xbf16>
    %c0_5 = arith.constant 0 : index
    %c0_6 = arith.constant 0 : index
    %8 = vector.load %arg4[%c0_5, %c0_6] : memref<16x96xbf16, #tpu.memory_space<vmem>>, vector<16x96xbf16>
    tpu.vector_store %arg4[%c0_5, %c0_6], %7 {strides = array<i32>} : memref<16x96xbf16, #tpu.memory_space<vmem>>, vector<16x96xbf16>,
    return
  }
  func.func @transform_0(%arg0: i32) -> (i32, i32) {
    %c0_i32 = arith.constant 0 : i32
    %c0_i32_0 = arith.constant 0 : i32
    return %arg0, %c0_i32 : i32, i32
  }
  func.func @transform_1(%arg0: i32) -> (i32, i32) {
    %c0_i32 = arith.constant 0 : i32
    %c0_i32_0 = arith.constant 0 : i32
    %c0_i32_1 = arith.constant 0 : i32
    return %c0_i32, %c0_i32_0 : i32, i32
  }
  func.func @transform_2(%arg0: i32) -> (i32, i32) {
    %c0_i32 = arith.constant 0 : i32
    %c0_i32_0 = arith.constant 0 : i32
    %c0_i32_1 = arith.constant 0 : i32
    return %c0_i32, %c0_i32_0 : i32, i32
  }
  func.func @transform_3(%arg0: i32) -> (i32, i32) {
    %c0_i32 = arith.constant 0 : i32
    %c0_i32_0 = arith.constant 0 : i32
    return %arg0, %c0_i32 : i32, i32
  }
}

module attributes {stable_mosaic.version = 11 : i64} {
  func.func @fc_ln_mask_kernel(%arg0: i32, %arg1: memref<16x32xbf16, #tpu.memory_space<vmem>>, %arg2: memref<16x32xf32, #tpu.memory_space<vmem>>, %arg3: memref<16x1xf32, #tpu.memory_space<vmem>>, %arg4: memref<32x32xbf16, #tpu.memory_space<vmem>>, %arg5: memref<1x32xf32, #tpu.memory_space<vmem>>, %arg6: memref<1x32xf32, #tpu.memory_space<vmem>>, %arg7: memref<1x32xf32, #tpu.memory_space<vmem>>, %arg8: memref<16x32xf32, #tpu.memory_space<vmem>>) attributes {dimension_semantics = [#tpu.dimension_semantics<parallel>], iteration_bounds = array<i64: 1>, scalar_prefetch = 0 : i64, scratch_operands = 0 : i64, tpu.core_type = #tpu.core_type<tc>, window_params = [{transform_indices = @transform_0, window_bounds = array<i64: 16, 32>}, {transform_indices = @transform_1, window_bounds = array<i64: 16, 32>}, {transform_indices = @transform_2, window_bounds = array<i64: 16, 1>}, {pipeline_mode = #tpu.pipeline_mode<synchronous>, transform_indices = @transform_3, window_bounds = array<i64: 32, 32>}, {pipeline_mode = #tpu.pipeline_mode<synchronous>, transform_indices = @transform_4, window_bounds = array<i64: 1, 32>}, {pipeline_mode = #tpu.pipeline_mode<synchronous>, transform_indices = @transform_5, window_bounds = array<i64: 1, 32>}, {pipeline_mode = #tpu.pipeline_mode<synchronous>, transform_indices = @transform_6, window_bounds = array<i64: 1, 32>}, {transform_indices = @transform_7, window_bounds = array<i64: 16, 32>}]} {
    %c0 = arith.constant 0 : index
    %c0_0 = arith.constant 0 : index
    %0 = vector.load %arg1[%c0, %c0_0] : memref<16x32xbf16, #tpu.memory_space<vmem>>, vector<16x32xbf16>
    %c0_1 = arith.constant 0 : index
    %c0_2 = arith.constant 0 : index
    %1 = vector.load %arg4[%c0_1, %c0_2] : memref<32x32xbf16, #tpu.memory_space<vmem>>, vector<32x32xbf16>
    %cst = arith.constant dense<0.000000e+00> : vector<16x32xf32>
    %2 = tpu.matmul %0, %1, %cst {dimension_numbers = #tpu.dot_dimension_numbers<[1], [0], [0], [1], [0, 0, 1, 1], [], []>} : vector<16x32xbf16>, vector<32x32xbf16>, vector<16x32xf32> -> vector<16x32xf32>
    %c0_3 = arith.constant 0 : index
    %c0_4 = arith.constant 0 : index
    %3 = vector.load %arg5[%c0_3, %c0_4] : memref<1x32xf32, #tpu.memory_space<vmem>>, vector<1x32xf32>
    %4 = vector.broadcast %3 : vector<1x32xf32> to vector<16x32xf32>
    %5 = arith.addf %2, %4 : vector<16x32xf32>
    %c0_5 = arith.constant 0 : index
    %c0_6 = arith.constant 0 : index
    %6 = vector.load %arg2[%c0_5, %c0_6] : memref<16x32xf32, #tpu.memory_space<vmem>>, vector<16x32xf32>
    %7 = arith.addf %5, %6 : vector<16x32xf32>
    %cst_7 = arith.constant dense<0.000000e+00> : vector<16xf32>
    %8 = vector.multi_reduction <add>, %7, %cst_7 [1] : vector<16x32xf32> to vector<16xf32>
    %9 = vector.shape_cast %8 : vector<16xf32> to vector<16x1xf32>
    %cst_8 = arith.constant 3.200000e+01 : f32
    %10 = vector.broadcast %cst_8 : f32 to vector<16x1xf32>
    %11 = arith.divf %9, %10 : vector<16x1xf32>
    %12 = vector.broadcast %11 : vector<16x1xf32> to vector<16x32xf32>
    %13 = arith.subf %7, %12 : vector<16x32xf32>
    %14 = arith.mulf %13, %13 : vector<16x32xf32>
    %cst_9 = arith.constant dense<0.000000e+00> : vector<16xf32>
    %15 = vector.multi_reduction <add>, %14, %cst_9 [1] : vector<16x32xf32> to vector<16xf32>
    %16 = vector.shape_cast %15 : vector<16xf32> to vector<16x1xf32>
    %cst_10 = arith.constant 3.200000e+01 : f32
    %17 = vector.broadcast %cst_10 : f32 to vector<16x1xf32>
    %18 = arith.divf %16, %17 : vector<16x1xf32>
    %19 = vector.broadcast %11 : vector<16x1xf32> to vector<16x32xf32>
    %20 = arith.subf %7, %19 : vector<16x32xf32>
    %cst_11 = arith.constant 9.99999974E-6 : f32
    %21 = vector.broadcast %cst_11 : f32 to vector<16x1xf32>
    %22 = arith.addf %18, %21 : vector<16x1xf32>
    %23 = math.rsqrt %22 : vector<16x1xf32>
    %24 = vector.broadcast %23 : vector<16x1xf32> to vector<16x32xf32>
    %25 = arith.mulf %20, %24 : vector<16x32xf32>
    %c0_12 = arith.constant 0 : index
    %c0_13 = arith.constant 0 : index
    %26 = vector.load %arg6[%c0_12, %c0_13] : memref<1x32xf32, #tpu.memory_space<vmem>>, vector<1x32xf32>
    %27 = vector.broadcast %26 : vector<1x32xf32> to vector<16x32xf32>
    %28 = arith.mulf %25, %27 : vector<16x32xf32>
    %c0_14 = arith.constant 0 : index
    %c0_15 = arith.constant 0 : index
    %29 = vector.load %arg7[%c0_14, %c0_15] : memref<1x32xf32, #tpu.memory_space<vmem>>, vector<1x32xf32>
    %30 = vector.broadcast %29 : vector<1x32xf32> to vector<16x32xf32>
    %31 = arith.addf %28, %30 : vector<16x32xf32>
    %c0_16 = arith.constant 0 : index
    %c0_17 = arith.constant 0 : index
    %32 = vector.load %arg3[%c0_16, %c0_17] : memref<16x1xf32, #tpu.memory_space<vmem>>, vector<16x1xf32>
    %33 = vector.broadcast %32 : vector<16x1xf32> to vector<16x32xf32>
    %34 = arith.mulf %31, %33 : vector<16x32xf32>
    %c0_18 = arith.constant 0 : index
    %c0_19 = arith.constant 0 : index
    %35 = vector.load %arg8[%c0_18, %c0_19] : memref<16x32xf32, #tpu.memory_space<vmem>>, vector<16x32xf32>
    tpu.vector_store %arg8[%c0_18, %c0_19], %34 {strides = array<i32>} : memref<16x32xf32, #tpu.memory_space<vmem>>, vector<16x32xf32>,
    return
  }
  func.func @transform_0(%arg0: i32) -> (i32, i32) {
    %c0_i32 = arith.constant 0 : i32
    %c0_i32_0 = arith.constant 0 : i32
    return %arg0, %c0_i32 : i32, i32
  }
  func.func @transform_1(%arg0: i32) -> (i32, i32) {
    %c0_i32 = arith.constant 0 : i32
    %c0_i32_0 = arith.constant 0 : i32
    return %arg0, %c0_i32 : i32, i32
  }
  func.func @transform_2(%arg0: i32) -> (i32, i32) {
    %c0_i32 = arith.constant 0 : i32
    %c0_i32_0 = arith.constant 0 : i32
    return %arg0, %c0_i32 : i32, i32
  }
  func.func @transform_3(%arg0: i32) -> (i32, i32) {
    %c0_i32 = arith.constant 0 : i32
    %c0_i32_0 = arith.constant 0 : i32
    %c0_i32_1 = arith.constant 0 : i32
    return %c0_i32, %c0_i32_0 : i32, i32
  }
  func.func @transform_4(%arg0: i32) -> (i32, i32) {
    %c0_i32 = arith.constant 0 : i32
    %c0_i32_0 = arith.constant 0 : i32
    %c0_i32_1 = arith.constant 0 : i32
    return %c0_i32, %c0_i32_0 : i32, i32
  }
  func.func @transform_5(%arg0: i32) -> (i32, i32) {
    %c0_i32 = arith.constant 0 : i32
    %c0_i32_0 = arith.constant 0 : i32
    %c0_i32_1 = arith.constant 0 : i32
    return %c0_i32, %c0_i32_0 : i32, i32
  }
  func.func @transform_6(%arg0: i32) -> (i32, i32) {
    %c0_i32 = arith.constant 0 : i32
    %c0_i32_0 = arith.constant 0 : i32
    %c0_i32_1 = arith.constant 0 : i32
    return %c0_i32, %c0_i32_0 : i32, i32
  }
  func.func @transform_7(%arg0: i32) -> (i32, i32) {
    %c0_i32 = arith.constant 0 : i32
    %c0_i32_0 = arith.constant 0 : i32
    return %arg0, %c0_i32 : i32, i32
  }
}

module attributes {stable_mosaic.version = 11 : i64} {
  func.func @proj_kernel(%arg0: i32, %arg1: memref<16x32xf32, #tpu.memory_space<vmem>>, %arg2: memref<32x32xbf16, #tpu.memory_space<vmem>>, %arg3: memref<1x32xf32, #tpu.memory_space<vmem>>, %arg4: memref<16x32xbf16, #tpu.memory_space<vmem>>) attributes {dimension_semantics = [#tpu.dimension_semantics<parallel>], iteration_bounds = array<i64: 1>, scalar_prefetch = 0 : i64, scratch_operands = 0 : i64, tpu.core_type = #tpu.core_type<tc>, window_params = [{transform_indices = @transform_0, window_bounds = array<i64: 16, 32>}, {pipeline_mode = #tpu.pipeline_mode<synchronous>, transform_indices = @transform_1, window_bounds = array<i64: 32, 32>}, {pipeline_mode = #tpu.pipeline_mode<synchronous>, transform_indices = @transform_2, window_bounds = array<i64: 1, 32>}, {transform_indices = @transform_3, window_bounds = array<i64: 16, 32>}]} {
    %c0 = arith.constant 0 : index
    %c0_0 = arith.constant 0 : index
    %0 = vector.load %arg1[%c0, %c0_0] : memref<16x32xf32, #tpu.memory_space<vmem>>, vector<16x32xf32>
    %1 = arith.truncf %0 : vector<16x32xf32> to vector<16x32xbf16>
    %c0_1 = arith.constant 0 : index
    %c0_2 = arith.constant 0 : index
    %2 = vector.load %arg2[%c0_1, %c0_2] : memref<32x32xbf16, #tpu.memory_space<vmem>>, vector<32x32xbf16>
    %cst = arith.constant dense<0.000000e+00> : vector<16x32xf32>
    %3 = tpu.matmul %1, %2, %cst {dimension_numbers = #tpu.dot_dimension_numbers<[1], [0], [0], [1], [0, 0, 1, 1], [], []>} : vector<16x32xbf16>, vector<32x32xbf16>, vector<16x32xf32> -> vector<16x32xf32>
    %c0_3 = arith.constant 0 : index
    %c0_4 = arith.constant 0 : index
    %4 = vector.load %arg3[%c0_3, %c0_4] : memref<1x32xf32, #tpu.memory_space<vmem>>, vector<1x32xf32>
    %5 = vector.broadcast %4 : vector<1x32xf32> to vector<16x32xf32>
    %6 = arith.addf %3, %5 : vector<16x32xf32>
    %7 = arith.truncf %6 : vector<16x32xf32> to vector<16x32xbf16>
    %c0_5 = arith.constant 0 : index
    %c0_6 = arith.constant 0 : index
    %8 = vector.load %arg4[%c0_5, %c0_6] : memref<16x32xbf16, #tpu.memory_space<vmem>>, vector<16x32xbf16>
    tpu.vector_store %arg4[%c0_5, %c0_6], %7 {strides = array<i32>} : memref<16x32xbf16, #tpu.memory_space<vmem>>, vector<16x32xbf16>,
    return
  }
  func.func @transform_0(%arg0: i32) -> (i32, i32) {
    %c0_i32 = arith.constant 0 : i32
    %c0_i32_0 = arith.constant 0 : i32
    return %arg0, %c0_i32 : i32, i32
  }
  func.func @transform_1(%arg0: i32) -> (i32, i32) {
    %c0_i32 = arith.constant 0 : i32
    %c0_i32_0 = arith.constant 0 : i32
    %c0_i32_1 = arith.constant 0 : i32
    return %c0_i32, %c0_i32_0 : i32, i32
  }
  func.func @transform_2(%arg0: i32) -> (i32, i32) {
    %c0_i32 = arith.constant 0 : i32
    %c0_i32_0 = arith.constant 0 : i32
    %c0_i32_1 = arith.constant 0 : i32
    return %c0_i32, %c0_i32_0 : i32, i32
  }
  func.func @transform_3(%arg0: i32) -> (i32, i32) {
    %c0_i32 = arith.constant 0 : i32
    %c0_i32_0 = arith.constant 0 : i32
    return %arg0, %c0_i32 : i32, i32
  }
}

module attributes {stable_mosaic.version = 11 : i64} {
  func.func @ffn_ln_mask_kernel(%arg0: i32, %arg1: memref<16x32xf32, #tpu.memory_space<vmem>>, %arg2: memref<16x1xf32, #tpu.memory_space<vmem>>, %arg3: memref<32x64xbf16, #tpu.memory_space<vmem>>, %arg4: memref<1x64xf32, #tpu.memory_space<vmem>>, %arg5: memref<64x32xbf16, #tpu.memory_space<vmem>>, %arg6: memref<1x32xf32, #tpu.memory_space<vmem>>, %arg7: memref<1x32xf32, #tpu.memory_space<vmem>>, %arg8: memref<1x32xf32, #tpu.memory_space<vmem>>, %arg9: memref<16x32xf32, #tpu.memory_space<vmem>>) attributes {dimension_semantics = [#tpu.dimension_semantics<parallel>], iteration_bounds = array<i64: 1>, scalar_prefetch = 0 : i64, scratch_operands = 0 : i64, tpu.core_type = #tpu.core_type<tc>, window_params = [{transform_indices = @transform_0, window_bounds = array<i64: 16, 32>}, {transform_indices = @transform_1, window_bounds = array<i64: 16, 1>}, {pipeline_mode = #tpu.pipeline_mode<synchronous>, transform_indices = @transform_2, window_bounds = array<i64: 32, 64>}, {pipeline_mode = #tpu.pipeline_mode<synchronous>, transform_indices = @transform_3, window_bounds = array<i64: 1, 64>}, {pipeline_mode = #tpu.pipeline_mode<synchronous>, transform_indices = @transform_4, window_bounds = array<i64: 64, 32>}, {pipeline_mode = #tpu.pipeline_mode<synchronous>, transform_indices = @transform_5, window_bounds = array<i64: 1, 32>}, {pipeline_mode = #tpu.pipeline_mode<synchronous>, transform_indices = @transform_6, window_bounds = array<i64: 1, 32>}, {pipeline_mode = #tpu.pipeline_mode<synchronous>, transform_indices = @transform_7, window_bounds = array<i64: 1, 32>}, {transform_indices = @transform_8, window_bounds = array<i64: 16, 32>}]} {
    %c0 = arith.constant 0 : index
    %c0_0 = arith.constant 0 : index
    %0 = vector.load %arg1[%c0, %c0_0] : memref<16x32xf32, #tpu.memory_space<vmem>>, vector<16x32xf32>
    %1 = arith.truncf %0 : vector<16x32xf32> to vector<16x32xbf16>
    %c0_1 = arith.constant 0 : index
    %c0_2 = arith.constant 0 : index
    %2 = vector.load %arg3[%c0_1, %c0_2] : memref<32x64xbf16, #tpu.memory_space<vmem>>, vector<32x64xbf16>
    %cst = arith.constant dense<0.000000e+00> : vector<16x64xf32>
    %3 = tpu.matmul %1, %2, %cst {dimension_numbers = #tpu.dot_dimension_numbers<[1], [0], [0], [1], [0, 0, 1, 1], [], []>} : vector<16x32xbf16>, vector<32x64xbf16>, vector<16x64xf32> -> vector<16x64xf32>
    %c0_3 = arith.constant 0 : index
    %c0_4 = arith.constant 0 : index
    %4 = vector.load %arg4[%c0_3, %c0_4] : memref<1x64xf32, #tpu.memory_space<vmem>>, vector<1x64xf32>
    %5 = vector.broadcast %4 : vector<1x64xf32> to vector<16x64xf32>
    %6 = arith.addf %3, %5 : vector<16x64xf32>
    %cst_5 = arith.constant 0.000000e+00 : f32
    %7 = vector.broadcast %cst_5 : f32 to vector<16x64xf32>
    %8 = arith.maximumf %6, %7 : vector<16x64xf32>
    %9 = arith.truncf %8 : vector<16x64xf32> to vector<16x64xbf16>
    %c0_6 = arith.constant 0 : index
    %c0_7 = arith.constant 0 : index
    %10 = vector.load %arg5[%c0_6, %c0_7] : memref<64x32xbf16, #tpu.memory_space<vmem>>, vector<64x32xbf16>
    %cst_8 = arith.constant dense<0.000000e+00> : vector<16x32xf32>
    %11 = tpu.matmul %9, %10, %cst_8 {dimension_numbers = #tpu.dot_dimension_numbers<[1], [0], [0], [1], [0, 0, 1, 1], [], []>} : vector<16x64xbf16>, vector<64x32xbf16>, vector<16x32xf32> -> vector<16x32xf32>
    %c0_9 = arith.constant 0 : index
    %c0_10 = arith.constant 0 : index
    %12 = vector.load %arg6[%c0_9, %c0_10] : memref<1x32xf32, #tpu.memory_space<vmem>>, vector<1x32xf32>
    %13 = vector.broadcast %12 : vector<1x32xf32> to vector<16x32xf32>
    %14 = arith.addf %11, %13 : vector<16x32xf32>
    %15 = arith.addf %14, %0 : vector<16x32xf32>
    %cst_11 = arith.constant dense<0.000000e+00> : vector<16xf32>
    %16 = vector.multi_reduction <add>, %15, %cst_11 [1] : vector<16x32xf32> to vector<16xf32>
    %17 = vector.shape_cast %16 : vector<16xf32> to vector<16x1xf32>
    %cst_12 = arith.constant 3.200000e+01 : f32
    %18 = vector.broadcast %cst_12 : f32 to vector<16x1xf32>
    %19 = arith.divf %17, %18 : vector<16x1xf32>
    %20 = vector.broadcast %19 : vector<16x1xf32> to vector<16x32xf32>
    %21 = arith.subf %15, %20 : vector<16x32xf32>
    %22 = arith.mulf %21, %21 : vector<16x32xf32>
    %cst_13 = arith.constant dense<0.000000e+00> : vector<16xf32>
    %23 = vector.multi_reduction <add>, %22, %cst_13 [1] : vector<16x32xf32> to vector<16xf32>
    %24 = vector.shape_cast %23 : vector<16xf32> to vector<16x1xf32>
    %cst_14 = arith.constant 3.200000e+01 : f32
    %25 = vector.broadcast %cst_14 : f32 to vector<16x1xf32>
    %26 = arith.divf %24, %25 : vector<16x1xf32>
    %27 = vector.broadcast %19 : vector<16x1xf32> to vector<16x32xf32>
    %28 = arith.subf %15, %27 : vector<16x32xf32>
    %cst_15 = arith.constant 9.99999974E-6 : f32
    %29 = vector.broadcast %cst_15 : f32 to vector<16x1xf32>
    %30 = arith.addf %26, %29 : vector<16x1xf32>
    %31 = math.rsqrt %30 : vector<16x1xf32>
    %32 = vector.broadcast %31 : vector<16x1xf32> to vector<16x32xf32>
    %33 = arith.mulf %28, %32 : vector<16x32xf32>
    %c0_16 = arith.constant 0 : index
    %c0_17 = arith.constant 0 : index
    %34 = vector.load %arg7[%c0_16, %c0_17] : memref<1x32xf32, #tpu.memory_space<vmem>>, vector<1x32xf32>
    %35 = vector.broadcast %34 : vector<1x32xf32> to vector<16x32xf32>
    %36 = arith.mulf %33, %35 : vector<16x32xf32>
    %c0_18 = arith.constant 0 : index
    %c0_19 = arith.constant 0 : index
    %37 = vector.load %arg8[%c0_18, %c0_19] : memref<1x32xf32, #tpu.memory_space<vmem>>, vector<1x32xf32>
    %38 = vector.broadcast %37 : vector<1x32xf32> to vector<16x32xf32>
    %39 = arith.addf %36, %38 : vector<16x32xf32>
    %c0_20 = arith.constant 0 : index
    %c0_21 = arith.constant 0 : index
    %40 = vector.load %arg2[%c0_20, %c0_21] : memref<16x1xf32, #tpu.memory_space<vmem>>, vector<16x1xf32>
    %41 = vector.broadcast %40 : vector<16x1xf32> to vector<16x32xf32>
    %42 = arith.mulf %39, %41 : vector<16x32xf32>
    %c0_22 = arith.constant 0 : index
    %c0_23 = arith.constant 0 : index
    %43 = vector.load %arg9[%c0_22, %c0_23] : memref<16x32xf32, #tpu.memory_space<vmem>>, vector<16x32xf32>
    tpu.vector_store %arg9[%c0_22, %c0_23], %42 {strides = array<i32>} : memref<16x32xf32, #tpu.memory_space<vmem>>, vector<16x32xf32>,
    return
  }
  func.func @transform_0(%arg0: i32) -> (i32, i32) {
    %c0_i32 = arith.constant 0 : i32
    %c0_i32_0 = arith.constant 0 : i32
    return %arg0, %c0_i32 : i32, i32
  }
  func.func @transform_1(%arg0: i32) -> (i32, i32) {
    %c0_i32 = arith.constant 0 : i32
    %c0_i32_0 = arith.constant 0 : i32
    return %arg0, %c0_i32 : i32, i32
  }
  func.func @transform_2(%arg0: i32) -> (i32, i32) {
    %c0_i32 = arith.constant 0 : i32
    %c0_i32_0 = arith.constant 0 : i32
    %c0_i32_1 = arith.constant 0 : i32
    return %c0_i32, %c0_i32_0 : i32, i32
  }
  func.func @transform_3(%arg0: i32) -> (i32, i32) {
    %c0_i32 = arith.constant 0 : i32
    %c0_i32_0 = arith.constant 0 : i32
    %c0_i32_1 = arith.constant 0 : i32
    return %c0_i32, %c0_i32_0 : i32, i32
  }
  func.func @transform_4(%arg0: i32) -> (i32, i32) {
    %c0_i32 = arith.constant 0 : i32
    %c0_i32_0 = arith.constant 0 : i32
    %c0_i32_1 = arith.constant 0 : i32
    return %c0_i32, %c0_i32_0 : i32, i32
  }
  func.func @transform_5(%arg0: i32) -> (i32, i32) {
    %c0_i32 = arith.constant 0 : i32
    %c0_i32_0 = arith.constant 0 : i32
    %c0_i32_1 = arith.constant 0 : i32
    return %c0_i32, %c0_i32_0 : i32, i32
  }
  func.func @transform_6(%arg0: i32) -> (i32, i32) {
    %c0_i32 = arith.constant 0 : i32
    %c0_i32_0 = arith.constant 0 : i32
    %c0_i32_1 = arith.constant 0 : i32
    return %c0_i32, %c0_i32_0 : i32, i32
  }
  func.func @transform_7(%arg0: i32) -> (i32, i32) {
    %c0_i32 = arith.constant 0 : i32
    %c0_i32_0 = arith.constant 0 : i32
    %c0_i32_1 = arith.constant 0 : i32
    return %c0_i32, %c0_i32_0 : i32, i32
  }
  func.func @transform_8(%arg0: i32) -> (i32, i32) {
    %c0_i32 = arith.constant 0 : i32
    %c0_i32_0 = arith.constant 0 : i32
    return %arg0, %c0_i32 : i32, i32
  }
}

module attributes {stable_mosaic.version = 11 : i64} {
  func.func @kernel(%arg0: i32, %arg1: i32, %arg2: memref<1x4x8x8xbf16, #tpu.memory_space<vmem>>, %arg3: memref<1x4x8x8xbf16, #tpu.memory_space<vmem>>, %arg4: memref<1x4x8x8xbf16, #tpu.memory_space<vmem>>, %arg5: memref<1x8x8xi8, #tpu.memory_space<vmem>>, %arg6: memref<1x4x8x8xbf16, #tpu.memory_space<vmem>>, %arg7: memref<4x1x8x8xf32, #tpu.memory_space<vmem>>) attributes {dimension_semantics = [#tpu.dimension_semantics<parallel>, #tpu.dimension_semantics<parallel>], iteration_bounds = array<i64: 2, 1>, scalar_prefetch = 0 : i64, scratch_operands = 0 : i64, tpu.core_type = #tpu.core_type<tc>, window_params = [{transform_indices = @transform_0, window_bounds = array<i64: 1, 4, 8, 8>}, {transform_indices = @transform_1, window_bounds = array<i64: 1, 4, 8, 8>}, {transform_indices = @transform_2, window_bounds = array<i64: 1, 4, 8, 8>}, {transform_indices = @transform_3, window_bounds = array<i64: 1, 8, 8>}, {transform_indices = @transform_4, window_bounds = array<i64: 1, 4, 8, 8>}, {transform_indices = @transform_5, window_bounds = array<i64: 4, 1, 8, 8>}]} {
    %c0 = arith.constant 0 : index
    %c0_0 = arith.constant 0 : index
    %c0_1 = arith.constant 0 : index
    %c0_2 = arith.constant 0 : index
    %0 = vector.load %arg2[%c0, %c0_0, %c0_1, %c0_2] : memref<1x4x8x8xbf16, #tpu.memory_space<vmem>>, vector<1x4x8x8xbf16>
    %1 = vector.shape_cast %0 : vector<1x4x8x8xbf16> to vector<4x8x8xbf16>
    %c0_3 = arith.constant 0 : index
    %c0_4 = arith.constant 0 : index
    %c0_5 = arith.constant 0 : index
    %c0_6 = arith.constant 0 : index
    %2 = vector.load %arg3[%c0_3, %c0_4, %c0_5, %c0_6] : memref<1x4x8x8xbf16, #tpu.memory_space<vmem>>, vector<1x4x8x8xbf16>
    %3 = vector.shape_cast %2 : vector<1x4x8x8xbf16> to vector<4x8x8xbf16>
    %c0_7 = arith.constant 0 : index
    %c0_8 = arith.constant 0 : index
    %c0_9 = arith.constant 0 : index
    %c0_10 = arith.constant 0 : index
    %4 = vector.load %arg4[%c0_7, %c0_8, %c0_9, %c0_10] : memref<1x4x8x8xbf16, #tpu.memory_space<vmem>>, vector<1x4x8x8xbf16>
    %5 = vector.shape_cast %4 : vector<1x4x8x8xbf16> to vector<4x8x8xbf16>
    %c0_11 = arith.constant 0 : index
    %c0_12 = arith.constant 0 : index
    %c0_13 = arith.constant 0 : index
    %6 = vector.load %arg5[%c0_11, %c0_12, %c0_13] : memref<1x8x8xi8, #tpu.memory_space<vmem>>, vector<1x8x8xi8>
    %7 = vector.shape_cast %6 : vector<1x8x8xi8> to vector<8x8xi8>
    %c0_i8 = arith.constant 0 : i8
    %8 = vector.broadcast %c0_i8 : i8 to vector<8x8xi8>
    %9 = arith.cmpi ne, %7, %8 : vector<8x8xi8>
    "tpu.trace_start"() <{level = 10 : i32, message = "hqd,hkd->hqk"}> : () -> ()
    %cst = arith.constant dense<0.000000e+00> : vector<4x8x8xf32>
    %10 = tpu.matmul %1, %3, %cst {dimension_numbers = #tpu.dot_dimension_numbers<[2], [2], [1], [1], [0, 0, 0, 1, 1, 1], [0], [0]>} : vector<4x8x8xbf16>, vector<4x8x8xbf16>, vector<4x8x8xf32> -> vector<4x8x8xf32>
    "tpu.trace_stop"() : () -> ()
    %cst_14 = arith.constant 0.353553385 : f32
    %11 = vector.broadcast %cst_14 : f32 to vector<4x8x8xf32>
    %12 = arith.mulf %10, %11 : vector<4x8x8xf32>
    %13 = vector.shape_cast %9 : vector<8x8xi1> to vector<1x8x8xi1>
    %cst_15 = arith.constant 0xFF800000 : f32
    %14 = vector.shape_cast %13 : vector<1x8x8xi1> to vector<1x8x8xi1>
    %15 = vector.broadcast %14 : vector<1x8x8xi1> to vector<4x8x8xi1>
    %16 = vector.broadcast %cst_15 : f32 to vector<4x8x8xf32>
    %17 = arith.select %15, %16, %12 : vector<4x8x8xi1>, vector<4x8x8xf32>
    %cst_16 = arith.constant dense<0xFF800000> : vector<4x8xf32>
    %18 = vector.multi_reduction <maximumf>, %17, %cst_16 [2] : vector<4x8x8xf32> to vector<4x8xf32>
    %19 = vector.shape_cast %18 : vector<4x8xf32> to vector<4x8x1xf32>
    %20 = vector.broadcast %19 : vector<4x8x1xf32> to vector<4x8x8xf32>
    %21 = arith.subf %17, %20 : vector<4x8x8xf32>
    %22 = math.exp %21 : vector<4x8x8xf32>
    %cst_17 = arith.constant dense<0.000000e+00> : vector<4x8xf32>
    %23 = vector.multi_reduction <add>, %22, %cst_17 [2] : vector<4x8x8xf32> to vector<4x8xf32>
    %24 = vector.shape_cast %23 : vector<4x8xf32> to vector<4x8x1xf32>
    %25 = tpu.reciprocal %24 {approx = true} : vector<4x8x1xf32> -> vector<4x8x1xf32>
    %26 = vector.broadcast %25 : vector<4x8x1xf32> to vector<4x8x8xf32>
    %27 = arith.mulf %22, %26 : vector<4x8x8xf32>
    %28 = vector.shape_cast %27 : vector<4x8x8xf32> to vector<4x1x8x8xf32>
    %c0_18 = arith.constant 0 : index
    %c0_19 = arith.constant 0 : index
    %c0_20 = arith.constant 0 : index
    %c0_21 = arith.constant 0 : index
    %29 = vector.load %arg7[%c0_18, %c0_19, %c0_20, %c0_21] : memref<4x1x8x8xf32, #tpu.memory_space<vmem>>, vector<4x1x8x8xf32>
    tpu.vector_store %arg7[%c0_18, %c0_19, %c0_20, %c0_21], %28 {strides = array<i32>} : memref<4x1x8x8xf32, #tpu.memory_space<vmem>>, vector<4x1x8x8xf32>,
    %30 = arith.truncf %27 : vector<4x8x8xf32> to vector<4x8x8xbf16>
    "tpu.trace_start"() <{level = 10 : i32, message = "hqk,hkd->hqd"}> : () -> ()
    %cst_22 = arith.constant dense<0.000000e+00> : vector<4x8x8xf32>
    %31 = tpu.matmul %30, %5, %cst_22 {dimension_numbers = #tpu.dot_dimension_numbers<[2], [1], [1], [2], [0, 0, 0, 1, 1, 2], [0], [0]>} : vector<4x8x8xbf16>, vector<4x8x8xbf16>, vector<4x8x8xf32> -> vector<4x8x8xf32>
    "tpu.trace_stop"() : () -> ()
    %32 = arith.truncf %31 : vector<4x8x8xf32> to vector<4x8x8xbf16>
    %c0_23 = arith.constant 0 : index
    %c0_24 = arith.constant 0 : index
    %c0_25 = arith.constant 0 : index
    %c0_26 = arith.constant 0 : index
    %33 = vector.load %arg6[%c0_23, %c0_24, %c0_25, %c0_26] : memref<1x4x8x8xbf16, #tpu.memory_space<vmem>>, vector<1x4x8x8xbf16>
    %34 = vector.shape_cast %33 : vector<1x4x8x8xbf16> to vector<4x8x8xbf16>
    %35 = vector.shape_cast %32 : vector<4x8x8xbf16> to vector<1x4x8x8xbf16>
    tpu.vector_store %arg6[%c0_23, %c0_24, %c0_25, %c0_26], %35 {strides = array<i32>} : memref<1x4x8x8xbf16, #tpu.memory_space<vmem>>, vector<1x4x8x8xbf16>,
    return
  }
  func.func @transform_0(%arg0: i32, %arg1: i32) -> (i32, i32, i32, i32) {
    %c0_i32 = arith.constant 0 : i32
    %c0_i32_0 = arith.constant 0 : i32
    %c0_i32_1 = arith.constant 0 : i32
    return %arg0, %c0_i32, %arg1, %c0_i32_0 : i32, i32, i32, i32
  }
  func.func @transform_1(%arg0: i32, %arg1: i32) -> (i32, i32, i32, i32) {
    %c0_i32 = arith.constant 0 : i32
    %c0_i32_0 = arith.constant 0 : i32
    %c0_i32_1 = arith.constant 0 : i32
    %c0_i32_2 = arith.constant 0 : i32
    return %arg0, %c0_i32, %c0_i32_0, %c0_i32_1 : i32, i32, i32, i32
  }
  func.func @transform_2(%arg0: i32, %arg1: i32) -> (i32, i32, i32, i32) {
    %c0_i32 = arith.constant 0 : i32
    %c0_i32_0 = arith.constant 0 : i32
    %c0_i32_1 = arith.constant 0 : i32
    %c0_i32_2 = arith.constant 0 : i32
    return %arg0, %c0_i32, %c0_i32_0, %c0_i32_1 : i32, i32, i32, i32
  }
  func.func @transform_3(%arg0: i32, %arg1: i32) -> (i32, i32, i32) {
    %c0_i32 = arith.constant 0 : i32
    %c0_i32_0 = arith.constant 0 : i32
    return %arg0, %arg1, %c0_i32 : i32, i32, i32
  }
  func.func @transform_4(%arg0: i32, %arg1: i32) -> (i32, i32, i32, i32) {
    %c0_i32 = arith.constant 0 : i32
    %c0_i32_0 = arith.constant 0 : i32
    %c0_i32_1 = arith.constant 0 : i32
    return %arg0, %c0_i32, %arg1, %c0_i32_0 : i32, i32, i32, i32
  }
  func.func @transform_5(%arg0: i32, %arg1: i32) -> (i32, i32, i32, i32) {
    %c0_i32 = arith.constant 0 : i32
    %c0_i32_0 = arith.constant 0 : i32
    %c0_i32_1 = arith.constant 0 : i32
    return %c0_i32, %arg0, %arg1, %c0_i32_0 : i32, i32, i32, i32
  }
}

</mosaic_0001>

<bundles_post_ra>
// kernel: tpu_custom_call.1
= control target key start
LH: loop header
LB: loop body
LE: loop exit
PB: predicated region body
PF: predicated region fallthrough
CT: control target
= control target key end

     0   :  { %7 = vsyncpa [#allocation3], 0  ;;  %s185_s0 = inlined_call_operand.hbm [shape: f32[8,128], index: 0, kind: input, shape index: {}]   ;;  %s186_s1 = inlined_call_operand.hbm [shape: f32[8,128], index: 1, kind: input, shape index: {}]   ;;  %s187_s2 = inlined_call_operand.hbm [shape: f32[8,128], index: 2, kind: output, shape index: {}]  }
   0x1   :  { %8 = vsyncpa [#allocation6], 0 }
   0x2   :  { %9 = vsyncpa [#allocation4], 0  ;;  %s131_s9 = smov [#allocation2]   ;;  %s132_s11 = smov [#allocation5]  }
   0x3   :  { %s16_s10 = sshll.u32 %s131_s9, 4  ;;  %s26_s12 = sshll.u32 %s132_s11, 4  ;;  %s17_s10 = int_to_ptr.vmem [resolvable:$true] %s16_s10  ;;  %s27_s12 = int_to_ptr.vmem [resolvable:$true] %s26_s12 }
   0x4   :  { %s59_s15 = scalar_lea.hbm %s185_s0, 128 }
   0x5   :  { %p60_p0 = scmp.ne.s32.totalorder %s185_s0, %s59_s15  ;;  %p63_p1 = scmp.lt.u32.totalorder %s59_s15, %s185_s0 }
   0x7   :  { %p65_p2 = pnand %p63_p1, %p60_p0 }
   0x9   :  { %68 = shalt.err (!%p65_p2)
}
   0xa   :  { %s69_s20 = scalar_lea.vmem %s17_s10, 128  ;;  %p74_p4 = scmp.lt.s32.totalorder %s17_s10, %s17_s10 }
   0xb   :  { %p70_p3 = scmp.ne.s32.totalorder %s17_s10, %s69_s20  ;;  %p75_p5 = scmp.lt.s32.totalorder %s69_s20, %s69_s20 }
   0xd   :  { %p76_p6 = por %p75_p5, %p74_p4 }
   0xf   :  { %p77_p7 = pnand %p76_p6, %p70_p3 }
  0x11   :  { %80 = shalt.err (!%p77_p7)
}
  0x12   :  { %19 = dma.hbm_to_vmem [thread:$0]  %s185_s0, 128, %s17_s10, [#allocation3]  }
  0x13   :  { %s81_s25 = scalar_lea.hbm %s186_s1, 128 }
  0x14   :  { %p82_p8 = scmp.ne.s32.totalorder %s186_s1, %s81_s25  ;;  %p85_p9 = scmp.lt.u32.totalorder %s81_s25, %s186_s1 }
  0x16   :  { %p87_p10 = pnand %p85_p9, %p82_p8 }
  0x18   :  { %90 = shalt.err (!%p87_p10)
}
  0x19   :  { %s91_s30 = scalar_lea.vmem %s27_s12, 128  ;;  %p96_p12 = scmp.lt.s32.totalorder %s27_s12, %s27_s12 }
  0x1a   :  { %p92_p11 = scmp.ne.s32.totalorder %s27_s12, %s91_s30  ;;  %p97_p13 = scmp.lt.s32.totalorder %s91_s30, %s91_s30 }
  0x1c   :  { %p98_p0 = por %p97_p13, %p96_p12 }
  0x1e   :  { %p99_p1 = pnand %p98_p0, %p92_p11 }
  0x20   :  { %102 = shalt.err (!%p99_p1)
}
  0x21   :  { %29 = dma.hbm_to_vmem [thread:$0]  %s186_s1, 128, %s27_s12, [#allocation6]  }
  0x22   :  { %125 = dma.done.wait [#allocation3], 128  }
  0x23   :  { %126 = vsyncadd [#allocation3], 4294967168 }
  0x24   :  { %127 = dma.done.wait [#allocation6], 128  }
  0x25   :  { %128 = vsyncadd [#allocation6], 4294967168  ;;  %s133_s4 = smov [#allocation7]   ;;  %v36_v0 = vld [vmem:[#allocation2] sm:$0xff]  ;;  %v37_v1 = vld [vmem:[#allocation5] sm:$0xff] }
  0x26   :  { %s46_s5 = sshll.u32 %s133_s4, 4  ;;  %v38_v2 = vadd.f32 %v37_v1, %v36_v0  ;;  %s47_s5 = int_to_ptr.vmem [resolvable:$true] %s46_s5 }
  0x27   :  { %s103_s6 = scalar_lea.vmem %s47_s5, 128  ;;  %p108_p3 = scmp.lt.s32.totalorder %s47_s5, %s47_s5 }
  0x28   :  { %39 = vst [vmem:[#allocation7] sm:$0xff] %v38_v2  ;;  %p104_p2 = scmp.ne.s32.totalorder %s47_s5, %s103_s6  ;;  %p109_p4 = scmp.lt.s32.totalorder %s103_s6, %s103_s6 }
  0x2a   :  { %p110_p5 = por %p109_p4, %p108_p3 }
  0x2c   :  { %p111_p6 = pnand %p110_p5, %p104_p2 }
  0x2e   :  { %114 = shalt.err (!%p111_p6)
}
  0x2f   :  { %s115_s8 = scalar_lea.hbm %s187_s2, 128 }
  0x30   :  { %p116_p7 = scmp.ne.s32.totalorder %s187_s2, %s115_s8  ;;  %p119_p8 = scmp.lt.u32.totalorder %s115_s8, %s187_s2 }
  0x32   :  { %p121_p9 = pnand %p119_p8, %p116_p7 }
  0x34   :  { %124 = shalt.err (!%p121_p9)
}
  0x35   :  { %49 = dma.vmem_to_hbm [thread:$0]  %s47_s5, 128, %s187_s2, [#allocation4]  }
  0x36   :  { %129 = dma.done.wait [#allocation4], 128  }
  0x37   :  { %130 = vsyncadd [#allocation4], 4294967168 }
  0x38   :  { %53 = vsyncpa [#allocation3], 1 }
  0x39   :  { %54 = vsyncpa [#allocation6], 1 }
  0x3a   :  { %55 = vsyncpa [#allocation4], 1 }

// kernel: decoder_layer_forward.12
= control target key start
LH: loop header
LB: loop body
LE: loop exit
PB: predicated region body
PF: predicated region fallthrough
CT: control target
= control target key end

     0   :  { %v124_v0 = vmov 0.0   ;;  %vm125_vm0 = vmmov 0   ;;  %vm41_vm1 = vcmask 261120   ;;  %vm94_vm2 = vcmask 519168   ;;  %s167_s1 = inlined_call_operand.vmem [shape: bf16[32,64], index: 1, kind: input, shape index: {}]   ;;  %s168_s0 = inlined_call_operand.vmem [shape: f32[16,32], index: 0, kind: input, shape index: {}]   ;;  %s169_s2 = inlined_call_operand.vmem [shape: f32[1,64], index: 2, kind: input, shape index: {}]   ;;  %s170_s3 = inlined_call_operand.vmem [shape: bf16[16,64], index: 3, kind: output, shape index: {}]  }
   0x1   :  { %112 = vmatprep.subr.bf16.mxu0 %v124_v0  ;;  %v122_v1 = vld [vmem:[%s167_s1] sm:$0xff]   ;;  %116 = vmatprep.mubr.msk.bf16.mxu0 %vm125_vm0, %v124_v0  ;;  %v123_v2 = vld [vmem:[%s167_s1 + $0x8] sm:$0xff]  }
   0x2   :  { %113 = vmatpush3.bf16.msra.mxu0 %v122_v1  ;;  %v15_v3 = vld [vmem:[%s168_s0] sm:$0xff]  ;;  %v16_v4 = vld [vmem:[%s168_s0 + $0x8] sm:$0xff] }
   0x3   :  { %114 = vmatprep.subr.bf16.mxu0 %v124_v0  ;;  %v17_v5 = vpack.c.bf16 %v16_v4, %v15_v3  ;;  %v101_v6 = vld [vmem:[%s169_s2] ss:$0 sm:$0xff] }
   0x6   :  { %115 = vmatpush3.bf16.msra.mxu0 %v123_v2 }
   0x9   :  { %117 = vmatmul.mubr.msk.bf16.vlgmr.msra.gmra.mrb[0].mxu0 %vm41_vm1, %v17_v5 }
  0xdc   :  { %v79_v7 = vpop.f32.mrb[0].mxu0 }
  0xdd   :  { %v80_v8 = vadd.f32 %v101_v6, %v79_v7  ;;  %v118_v9 = vpop.f32.mrb[1].mxu0 }
  0xde   :  { %v82_v10 = vpop.f32.mrb[2].mxu0 }
  0xdf   :  { %v107_v11 = vpack.c.bf16 %v80_v8, %v80_v8  ;;  %v83_v12 = vadd.f32 %v101_v6, %v82_v10  ;;  %v119_v13 = vpop.f32.mrb[3].mxu0 }
  0xe1   :  { %95 = vst.msk [vmem:[%s170_s3] sm:$0xf] %vm94_vm2, %v107_v11  ;;  %v108_v14 = vpack.c.bf16 %v83_v12, %v83_v12 }
  0xe3   :  { %96 = vst.msk [vmem:[%s170_s3 + $0x4] sm:$0xf] %vm94_vm2, %v108_v14 }

// kernel: decoder_layer_forward.8
= control target key start
LH: loop header
LB: loop body
LE: loop exit
PB: predicated region body
PF: predicated region fallthrough
CT: control target
= control target key end

     0   :  { %v124_v0 = vmov 0.0   ;;  %vm125_vm0 = vmmov 0   ;;  %vm41_vm1 = vcmask 261120   ;;  %vm94_vm2 = vcmask 781312   ;;  %s167_s1 = inlined_call_operand.vmem [shape: bf16[32,96], index: 1, kind: input, shape index: {}]   ;;  %s168_s0 = inlined_call_operand.vmem [shape: f32[16,32], index: 0, kind: input, shape index: {}]   ;;  %s169_s2 = inlined_call_operand.vmem [shape: f32[1,96], index: 2, kind: input, shape index: {}]   ;;  %s170_s3 = inlined_call_operand.vmem [shape: bf16[16,96], index: 3, kind: output, shape index: {}]  }
   0x1   :  { %112 = vmatprep.subr.bf16.mxu0 %v124_v0  ;;  %v122_v1 = vld [vmem:[%s167_s1] sm:$0xff]   ;;  %116 = vmatprep.mubr.msk.bf16.mxu0 %vm125_vm0, %v124_v0  ;;  %v123_v2 = vld [vmem:[%s167_s1 + $0x8] sm:$0xff]  }
   0x2   :  { %113 = vmatpush3.bf16.msra.mxu0 %v122_v1  ;;  %v15_v3 = vld [vmem:[%s168_s0] sm:$0xff]  ;;  %v16_v4 = vld [vmem:[%s168_s0 + $0x8] sm:$0xff] }
   0x3   :  { %114 = vmatprep.subr.bf16.mxu0 %v124_v0  ;;  %v17_v5 = vpack.c.bf16 %v16_v4, %v15_v3  ;;  %v101_v6 = vld [vmem:[%s169_s2] ss:$0 sm:$0xff] }
   0x6   :  { %115 = vmatpush3.bf16.msra.mxu0 %v123_v2 }
   0x9   :  { %117 = vmatmul.mubr.msk.bf16.vlgmr.msra.gmra.mrb[0].mxu0 %vm41_vm1, %v17_v5 }
  0xdc   :  { %v79_v7 = vpop.f32.mrb[0].mxu0 }
  0xdd   :  { %v80_v8 = vadd.f32 %v101_v6, %v79_v7  ;;  %v118_v9 = vpop.f32.mrb[1].mxu0 }
  0xde   :  { %v82_v10 = vpop.f32.mrb[2].mxu0 }
  0xdf   :  { %v107_v11 = vpack.c.bf16 %v80_v8, %v80_v8  ;;  %v83_v12 = vadd.f32 %v101_v6, %v82_v10  ;;  %v119_v13 = vpop.f32.mrb[3].mxu0 }
  0xe1   :  { %95 = vst.msk [vmem:[%s170_s3] sm:$0xf] %vm94_vm2, %v107_v11  ;;  %v108_v14 = vpack.c.bf16 %v83_v12, %v83_v12 }
  0xe3   :  { %96 = vst.msk [vmem:[%s170_s3 + $0x4] sm:$0xf] %vm94_vm2, %v108_v14 }

// kernel: decoder_layer_forward.10
= control target key start
LH: loop header
LB: loop body
LE: loop exit
PB: predicated region body
PF: predicated region fallthrough
CT: control target
= control target key end

     0   :  { %v201_v0 = vmov 0.0   ;;  %vm202_vm0 = vmmov 0   ;;  %vm57_vm1 = vcmask 261120   ;;  %v203_v17 = vmov 0   ;;  %s287_s3 = inlined_call_operand.vmem [shape: bf16[32,32], index: 3, kind: input, shape index: {}]   ;;  %s288_s0 = inlined_call_operand.vmem [shape: bf16[16,32], index: 0, kind: input, shape index: {}]   ;;  %s289_s4 = inlined_call_operand.vmem [shape: f32[1,32], index: 4, kind: input, shape index: {}]   ;;  %s290_s1 = inlined_call_operand.vmem [shape: f32[16,32], index: 1, kind: input, shape index: {}]   ;;  %s291_s2 = inlined_call_operand.vmem [shape: f32[16,1], index: 2, kind: input, shape index: {}]   ;;  %s292_s5 = inlined_call_operand.vmem [shape: f32[1,32], index: 5, kind: input, shape index: {}]   ;;  %s293_s6 = inlined_call_operand.vmem [shape: f32[1,32], index: 6, kind: input, shape index: {}]   ;;  %s294_s7 = inlined_call_operand.vmem [shape: f32[16,32], index: 7, kind: output, shape index: {}]  }
   0x1   :  { %181 = vmatprep.subr.bf16.mxu0 %v201_v0  ;;  %v194_v1 = vld [vmem:[%s287_s3] sm:$0xff]   ;;  %185 = vmatprep.mubr.msk.bf16.mxu0 %vm202_vm0, %v201_v0  ;;  %v195_v2 = vld [vmem:[%s287_s3 + $0x8] sm:$0xff]  }
   0x2   :  { %182 = vmatpush3.bf16.msra.mxu0 %v194_v1  ;;  %v196_v3 = vld [vmem:[%s288_s0] sm:$0xff]   ;;  %v103_v10 = vld [vmem:[%s290_s1 + $0x8] sm:$0xff]  ;;  %192 = vset.pattern.permute.xlu0 %v203_v17 }
   0x3   :  { %183 = vmatprep.subr.bf16.mxu0 %v201_v0  ;;  %v171_v4 = vld [vmem:[%s289_s4] ss:$0 sm:$0xff]  ;;  %193 = vset.pattern.permute.xlu1 %v203_v17  ;;  %v152_v29 = vld [vmem:[%s291_s2 + $0x8] sm:$0xff] }
   0x4   :  { %v102_v6 = vld [vmem:[%s290_s1] sm:$0xff] }
   0x5   :  { %v151_v18 = vld [vmem:[%s291_s2] sm:$0xff] }
   0x6   :  { %184 = vmatpush3.bf16.msra.mxu0 %v195_v2  ;;  %v176_v37 = vld [vmem:[%s292_s5] ss:$0 sm:$0xff] }
   0x7   :  { %v177_v39 = vld [vmem:[%s293_s6] ss:$0 sm:$0xff] }
   0x9   :  { %186 = vmatmul.mubr.msk.bf16.vlgmr.msra.gmra.mrb[0].mxu0 %vm57_vm1, %v196_v3 }
  0xdc   :  { %v95_v5 = vpop.f32.mrb[0].mxu0 }
  0xdd   :  { %v96_v7 = vadd.f32 %v171_v4, %v95_v5  ;;  %v187_v8 = vpop.f32.mrb[1].mxu0 }
  0xde   :  { %v98_v9 = vpop.f32.mrb[2].mxu0 }
  0xdf   :  { %v99_v11 = vadd.f32 %v171_v4, %v98_v9  ;;  %v188_v12 = vpop.f32.mrb[3].mxu0  ;;  %v104_v13 = vadd.f32 %v102_v6, %v96_v7 }
  0xe1   :  { %v106_v14 = vsel %vm57_vm1, %v104_v13, 0.0  ;;  %v105_v15 = vadd.f32 %v103_v10, %v99_v11 }
  0xe2   :  { %107 = vadd.xlane.f32.xlu0 %v106_v14 }
  0xe3   :  { %v109_v16 = vsel %vm57_vm1, %v105_v15, 0.0 }
  0xe6   :  { %110 = vadd.xlane.f32.xlu0 %v109_v16 }
  0xfc   :  { %155 = vperm.xlu0 %192, %v151_v18  }
 0x16f   :  { %v108_v19 = vpop.xlane.xlu0 %107 }
 0x170   :  { %v113_v20 = vmul.f32 0.03125, %v108_v19 }
 0x172   :  { %v115_v21 = vsub.f32 %v104_v13, %v113_v20 }
 0x173   :  { %v111_v22 = vpop.xlane.xlu0 %110 }
 0x174   :  { %v114_v23 = vmul.f32 0.03125, %v111_v22  ;;  %v117_v24 = vmul.f32 %v115_v21, %v115_v21 }
 0x176   :  { %v116_v25 = vsub.f32 %v105_v15, %v114_v23  ;;  %v119_v26 = vsel %vm57_vm1, %v117_v24, 0.0 }
 0x177   :  { %120 = vadd.xlane.f32.xlu1 %v119_v26 }
 0x178   :  { %v118_v27 = vmul.f32 %v116_v25, %v116_v25 }
 0x17a   :  { %v122_v28 = vsel %vm57_vm1, %v118_v27, 0.0 }
 0x17b   :  { %123 = vadd.xlane.f32.xlu1 %v122_v28  ;;  %v156_v42 = vpop.permute.xlu0 %155 }
 0x18c   :  { %160 = vperm.xlu1 %193, %v152_v29  }
 0x204   :  { %v121_v30 = vpop.xlane.xlu1 %120 }
 0x205   :  { %v125_v31 = vmul.f32 0.03125, %v121_v30 }
 0x207   :  { %v127_v32 = vadd.f32 1e-05, %v125_v31 }
 0x208   :  { %v124_v33 = vpop.xlane.xlu1 %123 }
 0x209   :  { %197 = vrsqrt.f32 %v127_v32  ;;  %v126_v34 = vmul.f32 0.03125, %v124_v33 }
 0x20b   :  { %v128_v35 = vadd.f32 1e-05, %v126_v34 }
 0x20c   :  { %v161_v47 = vpop.permute.xlu1 %160 }
 0x20d   :  { %199 = vrsqrt.f32 %v128_v35 }
 0x213   :  { %v198_v36 = vpop.eup %197 }
 0x214   :  { %v131_v38 = vmul.f32 %v198_v36, %v115_v21 }
 0x216   :  { %v140_v40 = vmul.f32 %v176_v37, %v131_v38 }
 0x217   :  { %v200_v41 = vpop.eup %199 }
 0x218   :  { %v149_v43 = vadd.f32 %v177_v39, %v140_v40  ;;  %v132_v44 = vmul.f32 %v200_v41, %v116_v25 }
 0x21a   :  { %v163_v45 = vmul.f32 %v156_v42, %v149_v43  ;;  %v141_v46 = vmul.f32 %v176_v37, %v132_v44 }
 0x21c   :  { %165 = vst.msk [vmem:[%s294_s7] sm:$0xff] %vm57_vm1, %v163_v45  ;;  %v150_v48 = vadd.f32 %v177_v39, %v141_v46 }
 0x21e   :  { %v164_v49 = vmul.f32 %v161_v47, %v150_v48 }
 0x220   :  { %166 = vst.msk [vmem:[%s294_s7 + $0x8] sm:$0xff] %vm57_vm1, %v164_v49 }

// kernel: decoder_layer_forward.11
= control target key start
LH: loop header
LB: loop body
LE: loop exit
PB: predicated region body
PF: predicated region fallthrough
CT: control target
= control target key end

     0   :  { %v124_v0 = vmov 0.0   ;;  %vm125_vm0 = vmmov 0   ;;  %vm41_vm1 = vcmask 261120   ;;  %vm94_vm2 = vcmask 257024   ;;  %s167_s1 = inlined_call_operand.vmem [shape: bf16[32,32], index: 1, kind: input, shape index: {}]   ;;  %s168_s0 = inlined_call_operand.vmem [shape: f32[16,32], index: 0, kind: input, shape index: {}]   ;;  %s169_s2 = inlined_call_operand.vmem [shape: f32[1,32], index: 2, kind: input, shape index: {}]   ;;  %s170_s3 = inlined_call_operand.vmem [shape: bf16[16,32], index: 3, kind: output, shape index: {}]  }
   0x1   :  { %112 = vmatprep.subr.bf16.mxu0 %v124_v0  ;;  %v122_v1 = vld [vmem:[%s167_s1] sm:$0xff]   ;;  %116 = vmatprep.mubr.msk.bf16.mxu0 %vm125_vm0, %v124_v0  ;;  %v123_v2 = vld [vmem:[%s167_s1 + $0x8] sm:$0xff]  }
   0x2   :  { %113 = vmatpush3.bf16.msra.mxu0 %v122_v1  ;;  %v15_v3 = vld [vmem:[%s168_s0] sm:$0xff]  ;;  %v16_v4 = vld [vmem:[%s168_s0 + $0x8] sm:$0xff] }
   0x3   :  { %114 = vmatprep.subr.bf16.mxu0 %v124_v0  ;;  %v17_v5 = vpack.c.bf16 %v16_v4, %v15_v3  ;;  %v101_v6 = vld [vmem:[%s169_s2] ss:$0 sm:$0xff] }
   0x6   :  { %115 = vmatpush3.bf16.msra.mxu0 %v123_v2 }
   0x9   :  { %117 = vmatmul.mubr.msk.bf16.vlgmr.msra.gmra.mrb[0].mxu0 %vm41_vm1, %v17_v5 }
  0xdc   :  { %v79_v7 = vpop.f32.mrb[0].mxu0 }
  0xdd   :  { %v80_v8 = vadd.f32 %v101_v6, %v79_v7  ;;  %v118_v9 = vpop.f32.mrb[1].mxu0 }
  0xde   :  { %v82_v10 = vpop.f32.mrb[2].mxu0 }
  0xdf   :  { %v107_v11 = vpack.c.bf16 %v80_v8, %v80_v8  ;;  %v83_v12 = vadd.f32 %v101_v6, %v82_v10  ;;  %v119_v13 = vpop.f32.mrb[3].mxu0 }
  0xe1   :  { %95 = vst.msk [vmem:[%s170_s3] sm:$0xf] %vm94_vm2, %v107_v11  ;;  %v108_v14 = vpack.c.bf16 %v83_v12, %v83_v12 }
  0xe3   :  { %96 = vst.msk [vmem:[%s170_s3 + $0x4] sm:$0xf] %vm94_vm2, %v108_v14 }

// kernel: decoder_layer_forward.15
= control target key start
LH: loop header
LB: loop body
LE: loop exit
PB: predicated region body
PF: predicated region fallthrough
CT: control target
= control target key end

     0   :  { %v350_v1 = vmov 0.0   ;;  %vm351_vm0 = vmmov 0   ;;  %vm57_vm1 = vcmask 261120   ;;  %s462_s0 = inlined_call_operand.vmem [shape: f32[16,32], index: 0, kind: input, shape index: {}]   ;;  %s463_s1 = inlined_call_operand.vmem [shape: f32[16,1], index: 1, kind: input, shape index: {}]   ;;  %s464_s2 = inlined_call_operand.vmem [shape: bf16[32,64], index: 2, kind: input, shape index: {}]   ;;  %s465_s3 = inlined_call_operand.vmem [shape: f32[1,64], index: 3, kind: input, shape index: {}]   ;;  %s466_s4 = inlined_call_operand.vmem [shape: bf16[64,32], index: 4, kind: input, shape index: {}]   ;;  %s467_s5 = inlined_call_operand.vmem [shape: f32[1,32], index: 5, kind: input, shape index: {}]   ;;  %s468_s6 = inlined_call_operand.vmem [shape: f32[1,32], index: 6, kind: input, shape index: {}]   ;;  %s469_s7 = inlined_call_operand.vmem [shape: f32[1,32], index: 7, kind: input, shape index: {}]   ;;  %s470_s8 = inlined_call_operand.hbm [shape: f32[16,32], index: 8, kind: output, shape index: {}]  }
   0x1   :  { %v316_v0 = vld [vmem:[%s464_s2] sm:$0xff]   ;;  %288 = vmatprep.subr.bf16.mxu0 %v350_v1  ;;  %v317_v2 = vld [vmem:[%s464_s2 + $0x8] sm:$0xff]   ;;  %296 = vmatprep.subr.bf16.mxu1 %v350_v1 }
   0x2   :  { %289 = vmatpush3.bf16.msra.mxu0 %v316_v0  ;;  %292 = vmatprep.mubr.msk.bf16.mxu0 %vm351_vm0, %v350_v1  ;;  %v31_v3 = vld [vmem:[%s462_s0] sm:$0xff]  ;;  %v32_v4 = vld [vmem:[%s462_s0 + $0x8] sm:$0xff] }
   0x3   :  { %290 = vmatprep.subr.bf16.mxu0 %v350_v1  ;;  %v318_v5 = vld [vmem:[%s466_s4] sm:$0xff]   ;;  %304 = vmatprep.mubr.msk.bf16.mxu1 %vm351_vm0, %v350_v1  ;;  %v319_v6 = vld [vmem:[%s466_s4 + $0x8] sm:$0xff]   ;;  %v33_v7 = vpack.c.bf16 %v32_v4, %v31_v3 }
   0x4   :  { %297 = vmatpush3.bf16.msra.mxu1 %v318_v5 }
   0x5   :  { %298 = vmatprep.subr.bf16.mxu1 %v350_v1 }
   0x6   :  { %291 = vmatpush3.bf16.msra.mxu0 %v317_v2 }
   0x7   :  { %13 = vsyncpa [#allocation3], 0  ;;  %v320_v8 = vld [vmem:[%s466_s4 + $0x10] sm:$0xff]   ;;  %v321_v9 = vld [vmem:[%s466_s4 + $0x18] sm:$0xff]   ;;  %vm144_vm2 = vcmask 523264   ;;  %v352_v32 = vmov 0  }
   0x8   :  { %299 = vmatpush3.bf16.msra.mxu1 %v319_v6  ;;  %v268_v10 = vld [vmem:[%s465_s3] ss:$0 sm:$0xff]  ;;  %314 = vset.pattern.permute.xlu0 %v352_v32  ;;  %v237_v43 = vld [vmem:[%s463_s1 + $0x8] sm:$0xff] }
   0x9   :  { %293 = vmatmul.mubr.msk.bf16.vlgmr.msra.gmra.mrb[0].mxu0 %vm57_vm1, %v33_v7  ;;  %300 = vmatprep.subr.bf16.mxu1 %v350_v1  ;;  %v272_v20 = vld [vmem:[%s467_s5] ss:$0 sm:$0xff] }
   0xa   :  { %v236_v31 = vld [vmem:[%s463_s1] sm:$0xff]  ;;  %315 = vset.pattern.permute.xlu1 %v352_v32  ;;  %s353_s1 = smov [#allocation2]  }
   0xb   :  { %v278_v51 = vld [vmem:[%s468_s6] ss:$0 sm:$0xff]  ;;  %s257_s28 = sshll.u32 %s353_s1, 4  ;;  %s258_s28 = int_to_ptr.vmem [resolvable:$true] %s257_s28 }
   0xc   :  { %301 = vmatpush3.bf16.msra.mxu1 %v320_v8  ;;  %v279_v53 = vld [vmem:[%s469_s7] ss:$0 sm:$0xff]  ;;  %s326_s6 = scalar_lea.vmem %s258_s28, 256  ;;  %p331_p1 = scmp.lt.s32.totalorder %s258_s28, %s258_s28 }
   0xd   :  { %302 = vmatprep.subr.bf16.mxu1 %v350_v1  ;;  %p327_p0 = scmp.ne.s32.totalorder %s258_s28, %s326_s6  ;;  %p332_p2 = scmp.lt.s32.totalorder %s326_s6, %s326_s6 }
   0xf   :  { %p333_p3 = por %p332_p2, %p331_p1 }
  0x10   :  { %303 = vmatpush3.bf16.msra.mxu1 %v321_v9 }
  0x11   :  { %p334_p4 = pnand %p333_p3, %p327_p0 }
  0xdc   :  { %v95_v11 = vpop.f32.mrb[0].mxu0 }
  0xdd   :  { %v96_v12 = vadd.f32 %v268_v10, %v95_v11  ;;  %v294_v13 = vpop.f32.mrb[1].mxu0 }
  0xde   :  { %v98_v14 = vpop.f32.mrb[2].mxu0 }
  0xdf   :  { %v99_v15 = vadd.f32 %v268_v10, %v98_v14  ;;  %v295_v16 = vpop.f32.mrb[3].mxu0  ;;  %v102_v17 = vmax.f32 %v96_v12, 0.0 }
  0xe1   :  { %v103_v18 = vmax.f32 %v99_v15, 0.0 }
  0xe3   :  { %v104_v19 = vpack.c.bf16 %v103_v18, %v102_v17 }
  0xe5   :  { %305 = vmatmul.mubr.msk.bf16.vlgmr.msra.gmra.mrb[0].mxu1 %vm144_vm2, %v104_v19 }
 0x1b8   :  { %v182_v21 = vpop.f32.mrb[0].mxu1 }
 0x1b9   :  { %v183_v22 = vadd.f32 %v272_v20, %v182_v21  ;;  %v306_v23 = vpop.f32.mrb[1].mxu1 }
 0x1ba   :  { %v185_v24 = vpop.f32.mrb[2].mxu1 }
 0x1bb   :  { %v186_v25 = vadd.f32 %v272_v20, %v185_v24  ;;  %v307_v26 = vpop.f32.mrb[3].mxu1  ;;  %v189_v27 = vadd.f32 %v183_v22, %v31_v3 }
 0x1bd   :  { %v191_v28 = vsel %vm57_vm1, %v189_v27, 0.0  ;;  %v190_v29 = vadd.f32 %v186_v25, %v32_v4 }
 0x1be   :  { %192 = vadd.xlane.f32.xlu0 %v191_v28 }
 0x1bf   :  { %v194_v30 = vsel %vm57_vm1, %v190_v29, 0.0 }
 0x1c2   :  { %195 = vadd.xlane.f32.xlu0 %v194_v30 }
 0x1d8   :  { %240 = vperm.xlu0 %314, %v236_v31  }
 0x24b   :  { %v193_v33 = vpop.xlane.xlu0 %192 }
 0x24c   :  { %v198_v34 = vmul.f32 0.03125, %v193_v33 }
 0x24e   :  { %v200_v35 = vsub.f32 %v189_v27, %v198_v34 }
 0x24f   :  { %v196_v36 = vpop.xlane.xlu0 %195 }
 0x250   :  { %v199_v37 = vmul.f32 0.03125, %v196_v36  ;;  %v202_v38 = vmul.f32 %v200_v35, %v200_v35 }
 0x252   :  { %v201_v39 = vsub.f32 %v190_v29, %v199_v37  ;;  %v204_v40 = vsel %vm57_vm1, %v202_v38, 0.0 }
 0x253   :  { %205 = vadd.xlane.f32.xlu1 %v204_v40 }
 0x254   :  { %v203_v41 = vmul.f32 %v201_v39, %v201_v39 }
 0x256   :  { %v207_v42 = vsel %vm57_vm1, %v203_v41, 0.0 }
 0x257   :  { %208 = vadd.xlane.f32.xlu1 %v207_v42  ;;  %v241_v56 = vpop.permute.xlu0 %240 }
 0x268   :  { %245 = vperm.xlu1 %315, %v237_v43  }
 0x2e0   :  { %v206_v44 = vpop.xlane.xlu1 %205 }
 0x2e1   :  { %v210_v45 = vmul.f32 0.03125, %v206_v44 }
 0x2e3   :  { %v212_v46 = vadd.f32 1e-05, %v210_v45 }
 0x2e4   :  { %v209_v47 = vpop.xlane.xlu1 %208 }
 0x2e5   :  { %322 = vrsqrt.f32 %v212_v46  ;;  %v211_v48 = vmul.f32 0.03125, %v209_v47 }
 0x2e7   :  { %v213_v49 = vadd.f32 1e-05, %v211_v48 }
 0x2e8   :  { %v246_v61 = vpop.permute.xlu1 %245 }
 0x2e9   :  { %324 = vrsqrt.f32 %v213_v49 }
 0x2ef   :  { %v323_v50 = vpop.eup %322 }
 0x2f0   :  { %v216_v52 = vmul.f32 %v323_v50, %v200_v35 }
 0x2f2   :  { %v225_v54 = vmul.f32 %v278_v51, %v216_v52 }
 0x2f3   :  { %v325_v55 = vpop.eup %324 }
 0x2f4   :  { %v234_v57 = vadd.f32 %v279_v53, %v225_v54  ;;  %v217_v58 = vmul.f32 %v325_v55, %v201_v39 }
 0x2f6   :  { %v248_v59 = vmul.f32 %v241_v56, %v234_v57  ;;  %v226_v60 = vmul.f32 %v278_v51, %v217_v58 }
 0x2f8   :  { %250 = vst.msk [vmem:[#allocation2] sm:$0xff] %vm57_vm1, %v248_v59  ;;  %v235_v62 = vadd.f32 %v279_v53, %v226_v60 }
 0x2fa   :  { %v249_v63 = vmul.f32 %v246_v61, %v235_v62 }
 0x2fc   :  { %251 = vst.msk [vmem:[#allocation2 + $0x8] sm:$0xff] %vm57_vm1, %v249_v63 }
 0x2fd   :  { %337 = shalt.err (!%p334_p4)
}
 0x2fe   :  { %s338_s30 = scalar_lea.hbm %s470_s8, 256 }
 0x2ff   :  { %p339_p5 = scmp.ne.s32.totalorder %s470_s8, %s338_s30  ;;  %p342_p6 = scmp.lt.u32.totalorder %s338_s30, %s470_s8 }
 0x301   :  { %p344_p7 = pnand %p342_p6, %p339_p5 }
 0x303   :  { %347 = shalt.err (!%p344_p7)
}
 0x304   :  { %s354_s13 = smov 128   ;;  %s355_s14 = smov 8  }
 0x305   :  { %263 = dma.vmem_to_hbm [thread:$0]  %s258_s28, 256, %s470_s8, [#allocation3], %s354_s13, %s354_s13, %s355_s14  }
 0x306   :  { %348 = dma.done.wait [#allocation3], 256  }
 0x307   :  { %349 = vsyncadd [#allocation3], 4294967040 }
 0x308   :  { %267 = vsyncpa [#allocation3], 1 }

// kernel: decoder_layer_forward.9
= control target key start
LH: loop header
LB: loop body
LE: loop exit
PB: predicated region body
PF: predicated region fallthrough
CT: control target
= control target key end

     0   :  { %11 = vsyncpa [#allocation3], 0  ;;  %s1469_s0 = inlined_call_operand.vmem [shape: bf16[2,4,8,8], index: 0, kind: input, shape index: {}]   ;;  %s1470_s1 = inlined_call_operand.vmem [shape: bf16[2,4,8,8], index: 1, kind: input, shape index: {}]   ;;  %s1471_s2 = inlined_call_operand.vmem [shape: bf16[2,4,8,8], index: 2, kind: input, shape index: {}]   ;;  %s1472_s3 = inlined_call_operand.vmem [shape: s8[2,8,8], index: 3, kind: input, shape index: {}]   ;;  %s1473_s4 = inlined_call_operand.vmem [shape: bf16[2,4,8,8], index: 4, kind: output, shape index: {0}]   ;;  %s1474_s5 = inlined_call_operand.hbm [shape: f32[4,2,8,8], index: 5, kind: output, shape index: {1}]  }
   0x1   :  { %13 = vsyncpa [#allocation3 + $0x1], 0  ;;  %s1264_s18 = smov 0   ;;  %s1266_s19 = smov 0  }
   0x2   :  { %s1268_s20 = smov 0   ;;  %s1270_s21 = smov 0  }
   0x3   :  { %s1272_s22 = smov 0   ;;  %s1274_s23 = smov 0  }
   0x4 LB: > { %s975_s24 = sadd.s32 4294967295, %s1225_s23   ;;  %s976_s25 = sadd.s32 4294967294, %s1225_s23   ;;  %s1225_s23 = sphi %s1274_s23, %s19_s23   ;;  %s1221_s22 = sphi %s1272_s22, %s1483_s22   ;;  %s1217_s21 = sphi %s1270_s21, %s1482_s21   ;;  %s1213_s20 = sphi %s1268_s20, %s1481_s20   ;;  %s1209_s19 = sphi %s1266_s19, %s1480_s19   ;;  %s1205_s18 = sphi %s1264_s18, %s1479_s18  }
   0x5   : > { %s31_s26 = sadd.s32 1, %s1221_s22  ;;  %s176_s27 = sadd.s32 1, %s1213_s20 }
   0x6   : > { %p33_p0 = scmp.ge.s32.totalorder %s31_s26, 2  ;;  %p186_p1 = scmp.ne.s32.totalorder %s1213_s20, %s1209_s19 }
   0x7   : > { %p187_p2 = scmp.eq.s32.totalorder %s975_s24, 1  ;;  %p192_p3 = scmp.ne.s32.totalorder %s1209_s19, %s1205_s18 }
   0x8   : > { %s1485_s26 = smov (%p33_p0, %s31_s26), 0  ;;  %p193_p5 = scmp.eq.s32.totalorder %s976_s25, 1 }
   0x9   : > { %p1304_p4 = por %p187_p2, %p186_p1  ;;  %s171_s29 = ssub.s32 %s1221_s22, %s1485_s26 }
   0xa   : > { %p979_p6 = scmp.ge.s32.totalorder %s1225_s23, 1  ;;  %p174_p7 = scmp.eq.s32.totalorder %s171_s29, 0 }
   0xb   : > { %p1311_p8 = por %p193_p5, %p192_p3  ;;  %p248_p9 = scmp.lt.s32.totalorder %s1225_s23, 3 }
   0xc   : > { %s1317_s6 = scalar_select %p174_p7, %s1213_s20, %s176_s27  }
   0xd   : > { %p249_p10 = pnand %p979_p6, %p248_p9 }
   0xe   : > { %p304_p11 = scmp.lt.s32.totalorder (!%p249_p10), %s1217_s21, 1  ;;  %v1227_v0 = vmov (!%p249_p10), 0.0   ;;  %vm1228_vm0 = vmmov (!%p249_p10), 0   ;;  %vm354_vm1 = vcmask (!%p249_p10), 64512   ;;  %v1229_v14 = vmov (!%p249_p10), 0  }
   0xf   : > { %252 = sbr.rel (%p249_p10) target bundleno = 793 (0x319), region = 36  ;;  %1022 = vmatprep.subr.bf16.mxu0 (!%p249_p10), %v1227_v0  ;;  %1028 = vmatprep.subr.bf16.mxu1 (!%p249_p10), %v1227_v0  ;;  %vm607_vm4 = vcmask (!%p249_p10), 1043456  }
  0x10   : > { %1024 = vmatprep.mubr.msk.bf16.mxu0 (!%p249_p10), %vm1228_vm0, %v1227_v0  ;;  %1030 = vmatprep.mubr.msk.bf16.mxu1 (!%p249_p10), %vm1228_vm0, %v1227_v0 }
  0x16   : > { %s1323_s7 = scalar_select %p304_p11, %s1217_s21, 1 }
  0x18   : > { %s1330_s8 = sshll.u32 %s1323_s7, 4  ;;  %s987_s15 = sshll.u32 %s1323_s7, 1 }
  0x19   : > { %s316_s11 = scalar_lea.vmem %s1470_s1, %s1330_s8  ;;  %s311_s14 = scalar_lea.vmem %s1469_s0, %s1330_s8 }
  0x1a   : > { %v344_v1 = vld [vmem:[%s316_s11] sm:$0xf]  ;;  %v345_v2 = vld [vmem:[%s316_s11 + $0x4] sm:$0xf]  ;;  %v346_v5 = vld [vmem:[%s316_s11 + $0x8] sm:$0xf]  ;;  %s328_s24 = scalar_lea.vmem %s1472_s3, %s987_s15  ;;  %s321_s29 = scalar_lea.vmem %s1471_s2, %s1330_s8 }
  0x1b   : > { %v359_v3 = vsel %vm354_vm1, %v344_v1, 0  ;;  %v405_v4 = vsel %vm354_vm1, %v345_v2, 0  ;;  %v347_v6 = vld [vmem:[%s316_s11 + $0xc] sm:$0xf]  ;;  %v340_v7 = vld [vmem:[%s311_s14] sm:$0xf] }
  0x1c   : > { %1023 = vmatpush3.bf16.xpose.msra.mxu0 %v359_v3  ;;  %1029 = vmatpush3.bf16.xpose.msra.mxu1 %v405_v4  ;;  %v341_v8 = vld [vmem:[%s311_s14 + $0x4] sm:$0xf]  ;;  %v451_v9 = vsel %vm354_vm1, %v346_v5, 0  ;;  %v497_v10 = vsel %vm354_vm1, %v347_v6, 0  ;;  %v342_v11 = vld [vmem:[%s311_s14 + $0x8] sm:$0xf] }
  0x1d   : > { %1034 = vmatprep.subr.bf16.mxu0 %v1227_v0  ;;  %1040 = vmatprep.subr.bf16.mxu1 %v1227_v0  ;;  %v343_v12 = vld [vmem:[%s311_s14 + $0xc] sm:$0xf]  ;;  %v352_v13 = vld [vmem:[%s328_s24] sm:$0x3]  ;;  %v349_v5 = vld [vmem:[%s321_s29 + $0x4] sm:$0xf] }
  0x1e   : > { %vm353_vm2 = vnez %v352_v13  ;;  %v348_v3 = vld [vmem:[%s321_s29] sm:$0xf]  ;;  %v655_v6 = vsel %vm607_vm4, %v349_v5, 0  ;;  %s301_s7 = sand.u32 1, %s1209_s19   ;;  %s999_s11 = sshll.u32 %s1217_s21, 7 }
  0x1f   : > { %v543_v15 = vsel %vm353_vm2, 16843009, %v1229_v14  ;;  %v609_v4 = vsel %vm607_vm4, %v348_v3, 0  ;;  %s980_s9 = sshll.u32 %s301_s7, 5  ;;  %s1409_s15 = scalar_lea.hbm %s1474_s5, %s999_s11 }
  0x20   : > { %v544_v16 = vunpack.c.0.s8 %v543_v15  ;;  %s303_s10 = scalar_lea.vmem [#allocation2], %s980_s9  ;;  %s1415_s16 = scalar_lea.sflag [#allocation3], %s301_s7 }
  0x21   : > { %s823_s12 = sshll.u32 %s303_s10, 4  ;;  %s1230_s21 = smov [#allocation2]   ;;  %s1411_s12 = int_to_ptr.vmem [resolvable:$true] %s823_s12 }
  0x22   : > { %vm1364_vm3 = vcmp.ne.s32.totalorder %v544_v16, 0  ;;  %s1147_s17 = scalar_lea.vmem %s1411_s12, 512  ;;  %s1151_s24 = sshll.u32 %s1230_s21, 4  ;;  %s1152_s24 = int_to_ptr.vmem [resolvable:$false] %s1151_s24 }
  0x23   : > { %1025 = vmatmul.mubr.msk.bf16.vlgmr.msra.gmra.mrb[0].mxu0 %vm354_vm1, %v340_v7  ;;  %1031 = vmatmul.mubr.msk.bf16.vlgmr.msra.gmra.mrb[0].mxu1 %vm354_vm1, %v341_v8  ;;  %v350_v7 = vld [vmem:[%s321_s29 + $0x8] sm:$0xf]  ;;  %p1148_p12 = scmp.ne.s32.totalorder %s1411_s12, %s1147_s17  ;;  %s1153_s25 = scalar_lea.vmem %s1152_s24, 1024 }
  0x24   : > { %1035 = vmatpush3.bf16.xpose.msra.mxu0 %v451_v9  ;;  %1041 = vmatpush3.bf16.xpose.msra.mxu1 %v497_v10  ;;  %v701_v8 = vsel %vm607_vm4, %v350_v7, 0  ;;  %v351_v9 = vld [vmem:[%s321_s29 + $0xc] sm:$0xf]  ;;  %p1154_p1 = scmp.lt.s32.totalorder %s1411_s12, %s1152_s24  ;;  %p1155_p2 = scmp.lt.s32.totalorder %s1153_s25, %s1147_s17 }
  0x25   : > { %1036 = vmatprep.mubr.msk.bf16.mxu0 %vm1228_vm0, %v1227_v0  ;;  %1042 = vmatprep.mubr.msk.bf16.mxu1 %vm1228_vm0, %v1227_v0  ;;  %v747_v10 = vsel %vm607_vm4, %v351_v9, 0  ;;  %p1149_p13 = pnand %p1148_p12, %p1304_p4 }
  0x26   : > { %1046 = vmatprep.subr.bf16.mxu0 %v1227_v0  ;;  %1052 = vmatprep.subr.bf16.mxu1 %v1227_v0  ;;  %p1156_p3 = por %p1155_p2, %p1154_p1 }
  0x27   : > { %p1150_p0 = pneg %p1149_p13 }
  0x29   : > { %p1157_p5 = pnand %p1156_p3, %p1150_p0 }
  0x2b   : > { %1037 = vmatmul.mubr.msk.bf16.vlgmr.msra.gmra.mrb[4].mxu0 %vm354_vm1, %v342_v11  ;;  %1043 = vmatmul.mubr.msk.bf16.vlgmr.msra.gmra.mrb[4].mxu1 %vm354_vm1, %v343_v12 }
  0x2c   : > { %1048 = vmatprep.mubr.msk.bf16.mxu0 %vm1228_vm0, %v1227_v0  ;;  %1054 = vmatprep.mubr.msk.bf16.mxu1 %vm1228_vm0, %v1227_v0 }
  0x2d   : > { %1047 = vmatpush3.bf16.msra.mxu0 %v609_v4  ;;  %1053 = vmatpush3.bf16.msra.mxu1 %v655_v6 }
  0x2e   : > { %1058 = vmatprep.subr.bf16.mxu0 %v1227_v0  ;;  %1064 = vmatprep.subr.bf16.mxu1 %v1227_v0 }
  0xf6   : > { %v395_v17 = vpop.f32.mrb[0].mxu0  ;;  %v441_v18 = vpop.f32.mrb[0].mxu1 }
  0xf7   : > { %v539_v20 = vmul.f32 0.35355338, %v395_v17  ;;  %v1026_v21 = vpop.f32.mrb[1].mxu0  ;;  %v540_v22 = vmul.f32 0.35355338, %v441_v18  ;;  %v1032_v23 = vpop.f32.mrb[1].mxu1 }
  0xf8   : > { %v398_v24 = vpop.f32.mrb[2].mxu0  ;;  %v444_v25 = vpop.f32.mrb[2].mxu1 }
  0xf9   : > { %v1027_v26 = vpop.f32.mrb[3].mxu0  ;;  %v1033_v27 = vpop.f32.mrb[3].mxu1  ;;  %v548_v28 = vsel %vm1364_vm3, -inf, %v539_v20  ;;  %v549_v29 = vsel %vm1364_vm3, -inf, %v540_v22 }
  0xfa   : > { %v552_v30 = vsel %vm354_vm1, %v548_v28, -inf  ;;  %v555_v31 = vsel %vm354_vm1, %v549_v29, -inf }
  0xfb   : > { %553 = vmax.xlane.f32.xlu0 %v552_v30 }
  0xfe   : > { %v487_v32 = vpop.f32.mrb[4].mxu0  ;;  %v533_v33 = vpop.f32.mrb[4].mxu1 }
  0xff   : > { %v541_v34 = vmul.f32 0.35355338, %v487_v32  ;;  %556 = vmax.xlane.f32.xlu0 %v555_v31  ;;  %v1038_v35 = vpop.f32.mrb[5].mxu0  ;;  %v542_v36 = vmul.f32 0.35355338, %v533_v33  ;;  %v1044_v37 = vpop.f32.mrb[5].mxu1 }
 0x100   : > { %v490_v38 = vpop.f32.mrb[6].mxu0  ;;  %v536_v39 = vpop.f32.mrb[6].mxu1 }
 0x101   : > { %v1039_v40 = vpop.f32.mrb[7].mxu0  ;;  %v1045_v41 = vpop.f32.mrb[7].mxu1  ;;  %v550_v42 = vsel %vm1364_vm3, -inf, %v541_v34  ;;  %v551_v43 = vsel %vm1364_vm3, -inf, %v542_v36 }
 0x102   : > { %v558_v44 = vsel %vm354_vm1, %v550_v42, -inf  ;;  %v561_v45 = vsel %vm354_vm1, %v551_v43, -inf }
 0x103   : > { %559 = vmax.xlane.f32.xlu1 %v558_v44 }
 0x107   : > { %562 = vmax.xlane.f32.xlu1 %v561_v45 }
 0x188   : > { %v554_v46 = vpop.xlane.xlu0 %553 }
 0x189   : > { %v564_v47 = vsub.f32 %v548_v28, %v554_v46 }
 0x18b   : > { %v568_v48 = vmul.f32 1.442695, %v564_v47 }
 0x18c   : > { %v557_v49 = vpop.xlane.xlu0 %556 }
 0x18d   : > { %1131 = vpow2.f32 %v568_v48  ;;  %v565_v50 = vsub.f32 %v549_v29, %v557_v49 }
 0x18f   : > { %v570_v51 = vmul.f32 1.442695, %v565_v50 }
 0x190   : > { %v560_v52 = vpop.xlane.xlu1 %559 }
 0x191   : > { %1133 = vpow2.f32 %v570_v51  ;;  %v566_v53 = vsub.f32 %v550_v42, %v560_v52 }
 0x193   : > { %v572_v54 = vmul.f32 1.442695, %v566_v53 }
 0x194   : > { %v563_v55 = vpop.xlane.xlu1 %562 }
 0x195   : > { %1135 = vpow2.f32 %v572_v54  ;;  %v567_v56 = vsub.f32 %v551_v43, %v563_v55 }
 0x197   : > { %v1132_v57 = vpop.eup %1131  ;;  %v574_v58 = vmul.f32 1.442695, %v567_v56 }
 0x198   : > { %v576_v59 = vsel %vm354_vm1, %v1132_v57, 0.0 }
 0x199   : > { %1137 = vpow2.f32 %v574_v58  ;;  %577 = vadd.xlane.f32.xlu0 %v576_v59 }
 0x19b   : > { %v1134_v60 = vpop.eup %1133 }
 0x19c   : > { %v579_v61 = vsel %vm354_vm1, %v1134_v60, 0.0 }
 0x19d   : > { %580 = vadd.xlane.f32.xlu1 %v579_v61 }
 0x19f   : > { %v1136_v62 = vpop.eup %1135 }
 0x1a0   : > { %v582_v63 = vsel %vm354_vm1, %v1136_v62, 0.0 }
 0x1a1   : > { %583 = vadd.xlane.f32.xlu0 %v582_v63 }
 0x1a3   : > { %v1138_v1 = vpop.eup %1137 }
 0x1a4   : > { %v585_v2 = vsel %vm354_vm1, %v1138_v1, 0.0 }
 0x1a5   : > { %586 = vadd.xlane.f32.xlu1 %v585_v2 }
 0x226   : > { %v578_v11 = vpop.xlane.xlu0 %577 }
 0x227   : > { %1139 = vrcp.f32 %v578_v11 }
 0x22a   : > { %v581_v12 = vpop.xlane.xlu1 %580 }
 0x22b   : > { %1141 = vrcp.f32 %v581_v12 }
 0x22e   : > { %v584_v13 = vpop.xlane.xlu0 %583 }
 0x22f   : > { %1143 = vrcp.f32 %v584_v13 }
 0x231   : > { %v1140_v14 = vpop.eup %1139 }
 0x232   : > { %v592_v15 = vmul.f32 %v1140_v14, %v1132_v57  ;;  %v587_v16 = vpop.xlane.xlu1 %586 }
 0x233   : > { %1145 = vrcp.f32 %v587_v16 }
 0x234   : > { %596 = vst.msk [vmem:[%s303_s10] sm:$0xff] %vm354_vm1, %v592_v15  ;;  %v600_v17 = vpack.c.bf16 %v592_v15, %v592_v15 }
 0x235   : > { %v1142_v18 = vpop.eup %1141 }
 0x236   : > { %v593_v19 = vmul.f32 %v1142_v18, %v1134_v60  ;;  %1049 = vmatmul.mubr.msk.bf16.vlgmr.msra.gmra.mrb[8].mxu0 %vm354_vm1, %v600_v17 }
 0x237   : > { %1059 = vmatpush3.bf16.msra.mxu0 %v701_v8  ;;  %1060 = vmatprep.mubr.msk.bf16.mxu0 %vm1228_vm0, %v1227_v0 }
 0x238   : > { %597 = vst.msk [vmem:[%s303_s10 + $0x8] sm:$0xff] %vm354_vm1, %v593_v19  ;;  %v601_v20 = vpack.c.bf16 %v593_v19, %v593_v19 }
 0x239   : > { %v1144_v21 = vpop.eup %1143 }
 0x23a   : > { %v594_v22 = vmul.f32 %v1144_v21, %v1136_v62  ;;  %1055 = vmatmul.mubr.msk.bf16.vlgmr.msra.gmra.mrb[8].mxu1 %vm354_vm1, %v601_v20 }
 0x23b   : > { %1065 = vmatpush3.bf16.msra.mxu1 %v747_v10  ;;  %1066 = vmatprep.mubr.msk.bf16.mxu1 %vm1228_vm0, %v1227_v0 }
 0x23c   : > { %598 = vst.msk [vmem:[%s303_s10 + $0x10] sm:$0xff] %vm354_vm1, %v594_v22  ;;  %v602_v23 = vpack.c.bf16 %v594_v22, %v594_v22 }
 0x23d   : > { %v1146_v24 = vpop.eup %1145 }
 0x23e   : > { %v595_v25 = vmul.f32 %v1146_v24, %v1138_v1  ;;  %1061 = vmatmul.mubr.msk.bf16.vlgmr.msra.gmra.mrb[12].mxu0 %vm354_vm1, %v602_v23 }
 0x240   : > { %599 = vst.msk [vmem:[%s303_s10 + $0x18] sm:$0xff] %vm354_vm1, %v595_v25  ;;  %v603_v26 = vpack.c.bf16 %v595_v25, %v595_v25 }
 0x242   : > { %1067 = vmatmul.mubr.msk.bf16.vlgmr.msra.gmra.mrb[12].mxu1 %vm354_vm1, %v603_v26 }
 0x243   : > { %1160 = shalt.err (!%p1157_p5)
}
 0x244   : > { %s1161_s27 = scalar_lea.hbm %s1409_s15, 512  ;;  %s1165_s9 = scalar_lea.hbm %s1474_s5, 1024 }
 0x245   : > { %p1162_p6 = scmp.ne.s32.totalorder %s1409_s15, %s1161_s27  ;;  %p1166_p10 = scmp.lt.u32.totalorder %s1409_s15, %s1474_s5 }
 0x246   : > { %p1167_p11 = scmp.lt.u32.totalorder %s1165_s9, %s1161_s27  ;;  %p1169_p13 = scmp.lt.u32.totalorder %s1161_s27, %s1409_s15 }
 0x247   : > { %p1163_p7 = pnand %p1162_p6, %p1304_p4 }
 0x248   : > { %p1168_p12 = por %p1167_p11, %p1166_p10 }
 0x249   : > { %p1164_p9 = pneg %p1163_p7 }
 0x24a   : > { %p1170_p0 = por %p1169_p13, %p1168_p12 }
 0x24c   : > { %p1171_p1 = pnand %p1170_p0, %p1164_p9 }
 0x24e   : > { %1174 = shalt.err (!%p1171_p1)
}
 0x24f   : > { %s1231_s13 = smov 128   ;;  %s1232_s14 = smov 256   ;;  %vm793_vm5 = vcmask 60416  }
 0x250   : > { %s1233_s17 = smov 8   ;;  %s336_s25 = scalar_lea.vmem %s1473_s4, %s1330_s8 }
 0x251   : > { %1070 = dma.vmem_to_hbm [thread:$0]  (%p1304_p4), %s1411_s12, 512, %s1409_s15, %s1415_s16, %s1231_s13, %s1232_s14, %s1233_s17  }
 0x309   : > { %v645_v0 = vpop.f32.mrb[8].mxu0 }
 0x30a   : > { %v789_v27 = vpack.c.bf16 %v645_v0, %v645_v0  ;;  %v1050_v28 = vpop.f32.mrb[9].mxu0 }
 0x30b   : > { %v648_v29 = vpop.f32.mrb[10].mxu0 }
 0x30c   : > { %794 = vst.msk [vmem:[%s336_s25] sm:$0xf] %vm793_vm5, %v789_v27  ;;  %v1051_v30 = vpop.f32.mrb[11].mxu0 }
 0x30d   : > { %v691_v31 = vpop.f32.mrb[8].mxu1 }
 0x30e   : > { %v790_v32 = vpack.c.bf16 %v691_v31, %v691_v31  ;;  %v1056_v33 = vpop.f32.mrb[9].mxu1 }
 0x30f   : > { %v694_v34 = vpop.f32.mrb[10].mxu1 }
 0x310   : > { %795 = vst.msk [vmem:[%s336_s25 + $0x4] sm:$0xf] %vm793_vm5, %v790_v32  ;;  %v1057_v35 = vpop.f32.mrb[11].mxu1 }
 0x311   : > { %v737_v36 = vpop.f32.mrb[12].mxu0 }
 0x312   : > { %v791_v37 = vpack.c.bf16 %v737_v36, %v737_v36  ;;  %v1062_v38 = vpop.f32.mrb[13].mxu0 }
 0x313   : > { %v740_v39 = vpop.f32.mrb[14].mxu0 }
 0x314   : > { %796 = vst.msk [vmem:[%s336_s25 + $0x8] sm:$0xf] %vm793_vm5, %v791_v37  ;;  %v1063_v40 = vpop.f32.mrb[15].mxu0 }
 0x315   : > { %v783_v41 = vpop.f32.mrb[12].mxu1 }
 0x316   : > { %v792_v42 = vpack.c.bf16 %v783_v41, %v783_v41  ;;  %v1068_v43 = vpop.f32.mrb[13].mxu1 }
 0x317   : > { %v786_v44 = vpop.f32.mrb[14].mxu1 }
 0x318   : > { %797 = vst.msk [vmem:[%s336_s25 + $0xc] sm:$0xf] %vm793_vm5, %v792_v42  ;;  %v1069_v45 = vpop.f32.mrb[15].mxu1 }
 0x319 PF: > { %p1076_p4 = scmp.ge.s32.totalorder %s1225_s23, 2  ;;  %s849_s28 = sand.u32 1, %s1205_s18  }
 0x31a   : > { %s850_s8 = scalar_lea.sflag [#allocation3], %s849_s28 }
 0x31b   : > { %p1073_p2 = pnand %p1076_p4, %p1311_p8 }
 0x31d   : > { %1200 = dma.done.wait (!%p1073_p2), %s850_s8, 512  }
 0x31e   : > { %1202 = vsyncadd (!%p1073_p2), %s850_s8, 4294966784  ;;  %s19_s23 = sadd.s32 1, %s1225_s23   ;;  %s1479_s18 = smov %s1209_s19 }
 0x31f   : > { %p16_p3 = scmp.ge.s32.totalorder %s19_s23, 4   ;;  %s1480_s19 = smov %s1213_s20 }
 0x320   : > { %s1481_s20 = smov %s1317_s6  ;;  %s1482_s21 = smov %s1221_s22 }
 0x321   : > { %s1483_s22 = smov %s1485_s26  ;;  %18 = sbr.rel (!%p16_p3) target bundleno = 4 (0x4), region = 92 }
 0x328   :  { %855 = vsyncpa [#allocation3], 1 }
 0x329   :  { %857 = vsyncpa [#allocation3 + $0x1], 1 }

</bundles_post_ra>
